<compile_context>
chip_gen: v7x
topology: tpu7x:2x2x1
jax: 0.10.0
libtpu: 0.0.40
codegen_flags: <defaults>
</compile_context>

<pallas_src>
import numpy as np
import jax
import jax.numpy as jnp
from jax.experimental import pallas as pl
from jax.experimental.pallas import tpu as pltpu


# ----------------------------------------------------------------------------
# Deterministic "parameters": the Gaussian window (same construction as
# SSIM.create_window in the PyTorch module, sigma = 1.5).
# ----------------------------------------------------------------------------
def _gaussian_1d(window_size: int, sigma: float = 1.5) -> np.ndarray:
    g = np.array(
        [np.exp(-((x - window_size // 2) ** 2) / float(2 * sigma ** 2))
         for x in range(window_size)],
        dtype=np.float64,
    )
    return (g / g.sum()).astype(np.float32)


def _banded_conv_matrix(size: int, g: np.ndarray) -> np.ndarray:
    """(size, size) matrix M with M[j, w] = g[j - w + p] for |j - w| <= p, so
    that `x @ M` is the 1-D 'same' correlation of x with g (zero padding is
    folded into the clipped band)."""
    p = g.shape[0] // 2
    idx = np.arange(size)
    d = idx[:, None] - idx[None, :]                       # j - w
    m = np.where(np.abs(d) <= p,
                 g[np.clip(d + p, 0, g.shape[0] - 1)],
                 np.float32(0.0))
    return m.astype(np.float32)


def _round_up(x: int, m: int) -> int:
    return ((x + m - 1) // m) * m


# ----------------------------------------------------------------------------
# Plane-batch sizing with honest VMEM accounting (f32 tiles are padded to
# multiples of (8, 128) on the minor two dims; count that for every buffer).
# ----------------------------------------------------------------------------
def _pick_plane_batch(N, H, W, budget_bytes=24 * 1024 * 1024):
    hs, wl = _round_up(H, 8), _round_up(W, 128)      # natural (H, W) layout
    ws, hl = _round_up(W, 8), _round_up(H, 128)      # transposed (W, H) layout
    in_bytes = 2 * 2 * hs * wl * 4                   # x1, x2 double-buffered blocks
    nat_tmp = 6 * hs * wl * 4                        # products + horizontal-conv temps
    tr_tmp = 7 * ws * hl * 4                         # transposed temps + 5 conv outputs
    per_plane = in_bytes + nat_tmp + tr_tmp
    fixed = 2 * 2 * 4 * (_round_up(W, 8) * _round_up(W, 128) +
                         _round_up(H, 8) * _round_up(H, 128))   # gh, gv (dbl-buffered)
    tn = max(8, min((budget_bytes - fixed) // max(per_plane, 1),
                    1024, _round_up(N, 8)))
    return (tn // 8) * 8


# ----------------------------------------------------------------------------
# Pallas kernel factory
# ----------------------------------------------------------------------------
def _make_ssim_kernel(TN, N, H, W, data_range, mask_planes):
    C1 = np.float32((0.01 * data_range) ** 2)
    C2 = np.float32((0.03 * data_range) ** 2)

    def kernel(x1_ref, x2_ref, gh_ref, gv_ref, out_ref):
        n = pl.program_id(0)

        x1 = x1_ref[...].astype(jnp.float32)     # (TN, H, W)
        x2 = x2_ref[...].astype(jnp.float32)
        gh = gh_ref[...]                         # (W, W) banded Gaussian (resident)
        gv = gv_ref[...]                         # (H, H) banded Gaussian (resident)

        def conv2d_same(a):
            # Horizontal 'same' conv: one MXU matmul over the lane axis
            # (zero padding folded into the band); default matmul precision.
            t = jnp.dot(a.reshape(TN * H, W), gh,
                        preferred_element_type=jnp.float32).reshape(TN, H, W)
            # Vertical 'same' conv: swap the minor dims (XLU transpose) so the
            # row axis lands on lanes, then a second banded MXU matmul.
            tt = jnp.swapaxes(t, 1, 2)           # (TN, W, H)
            o = jnp.dot(tt.reshape(TN * W, H), gv,
                        preferred_element_type=jnp.float32).reshape(TN, W, H)
            return o                             # stays in (plane, W, H) layout

        # Five conv inputs -> five separate matmul pipelines sharing gh / gv
        # (no concatenate copy; all downstream math is layout-agnostic).
        mu1 = conv2d_same(x1)
        mu2 = conv2d_same(x2)
        e11 = conv2d_same(x1 * x1)
        e22 = conv2d_same(x2 * x2)
        e12 = conv2d_same(x1 * x2)

        mu1_sq = mu1 * mu1
        mu2_sq = mu2 * mu2
        mu1_mu2 = mu1 * mu2
        sigma1_sq = jnp.maximum(e11 - mu1_sq, 0.0)   # torch.clamp(min=0)
        sigma2_sq = jnp.maximum(e22 - mu2_sq, 0.0)
        sigma12 = e12 - mu1_mu2                      # not clamped (matches torch)

        num = (2.0 * mu1_mu2 + C1) * (2.0 * sigma12 + C2)
        den = (mu1_sq + mu2_sq + C1) * (sigma1_sq + sigma2_sq + C2)
        # approx=False keeps the EUP reciprocal + refinement (exact enough for
        # tight tolerances); approx=True is a further free win if validated.
        ssim_map = num * pl.reciprocal(den, approx=False)

        if mask_planes:
            # Exact masking of the zero-filled padding planes in this block.
            plane = n * TN + jax.lax.broadcasted_iota(jnp.int32, (TN, W, H), 0)
            ssim_map = jnp.where(plane < N, ssim_map, 0.0)

        # Per-block partial sum (two-level reduce; the grid axis carries no
        # state, so it is safe to mark "parallel" -> megacore split on v7x).
        out_ref[...] = jnp.zeros((1, 1, 1), jnp.float32) + jnp.sum(ssim_map)

    return kernel


# ----------------------------------------------------------------------------
# Wrapper (glue): plane batching, banded matrices, final mean.
# ----------------------------------------------------------------------------
def ssim_pallas(img1, img2, window_size=11, data_range=1.0, size_average=True):
    assert img1.shape == img2.shape and img1.ndim == 4
    # TODO(synk): size_average=False (per-sample mean over [C,H,W]) would need
    # per-plane partial sums; only the global-mean path is implemented.
    B, C, H, W = img1.shape
    N = B * C

    g = _gaussian_1d(window_size, 1.5)
    # TODO(synk): for W or H >= a few hundred, tile the banded matrices into
    # MXU-native column blocks instead of dense (W,W)/(H,H) weights.
    gh = jnp.asarray(_banded_conv_matrix(W, g))     # (W, W), VMEM resident
    gv = jnp.asarray(_banded_conv_matrix(H, g))     # (H, H), VMEM resident

    TN = _pick_plane_batch(N, H, W)
    NP = _round_up(N, TN)
    G = NP // TN

    # No H/W halo and no dtype-cast round trip: reshape is free, only the
    # plane count is (optionally) zero-padded to a TN multiple.
    x1 = img1.reshape(N, H, W)
    x2 = img2.reshape(N, H, W)
    if NP != N:
        x1 = jnp.pad(x1, ((0, NP - N), (0, 0), (0, 0)))
        x2 = jnp.pad(x2, ((0, NP - N), (0, 0), (0, 0)))

    # TODO(synk): when W < 128, lane-pack k=128//W planes per lane row with a
    # block-diagonal Gh for ~k x better lane/MXU utilization (needs a plane
    # interleaving rearrangement, skipped here to avoid extra HBM traffic).
    kernel = _make_ssim_kernel(TN, N, H, W, data_range, NP != N)

    partial = pl.pallas_call(
        kernel,
        out_shape=jax.ShapeDtypeStruct((G, 1, 1), jnp.float32),
        grid_spec=pltpu.PrefetchScalarGridSpec(
            num_scalar_prefetch=0,
            grid=(G,),
            in_specs=[
                pl.BlockSpec((TN, H, W), lambda n: (n, 0, 0)),
                pl.BlockSpec((TN, H, W), lambda n: (n, 0, 0)),
                pl.BlockSpec((W, W), lambda n: (0, 0)),   # resident weights
                pl.BlockSpec((H, H), lambda n: (0, 0)),   # resident weights
            ],
            out_specs=pl.BlockSpec((1, 1, 1), lambda n: (n, 0, 0)),
        ),
        compiler_params=pltpu.CompilerParams(
            dimension_semantics=("parallel",),           # no cross-step state
            vmem_limit_bytes=48 * 1024 * 1024,           # safe on 64 MiB v7x
        ),
    )(x1, x2, gh, gv)

    total = jnp.sum(partial)                             # second reduce level
    return total / jnp.float32(N * H * W)


# ----------------------------------------------------------------------------
# Pure-JAX reference (grouped conv2d at HIGHEST precision, same math as the
# PyTorch module).
# ----------------------------------------------------------------------------
def ssim_ref(img1, img2, window_size=11, data_range=1.0):
    B, C, H, W = img1.shape
    g = _gaussian_1d(window_size, 1.5)
    w2 = np.outer(g, g).astype(np.float32)
    window = jnp.asarray(np.ascontiguousarray(
        np.broadcast_to(w2, (C, 1, window_size, window_size))))
    p = window_size // 2
    C1 = (0.01 * data_range) ** 2
    C2 = (0.03 * data_range) ** 2

    def conv(x):
        return jax.lax.conv_general_dilated(
            x, window, window_strides=(1, 1), padding=[(p, p), (p, p)],
            dimension_numbers=("NCHW", "OIHW", "NCHW"),
            feature_group_count=C, precision=jax.lax.Precision.HIGHEST)

    mu1, mu2 = conv(img1), conv(img2)
    mu1_sq, mu2_sq, mu1_mu2 = mu1 * mu1, mu2 * mu2, mu1 * mu2
    s1 = jnp.maximum(conv(img1 * img1) - mu1_sq, 0.0)
    s2 = jnp.maximum(conv(img2 * img2) - mu2_sq, 0.0)
    s12 = conv(img1 * img2) - mu1_mu2
    ssim_map = ((2 * mu1_mu2 + C1) * (2 * s12 + C2)
                / ((mu1_sq + mu2_sq + C1) * (s1 + s2 + C2)))
    return ssim_map.mean()


if __name__ == "__main__":
    key = jax.random.PRNGKey(0)
    k1, k2 = jax.random.split(key)
    B, C, H, W = 2, 4, 16, 16
    img1 = jax.random.uniform(k1, (B, C, H, W), dtype=jnp.float32)
    noise = jax.random.uniform(k2, (B, C, H, W), dtype=jnp.float32)
    img2 = jnp.clip(0.75 * img1 + 0.25 * noise, 0.0, 1.0)   # correlated pair

    out = jax.block_until_ready(ssim_pallas(img1, img2))
    ref = jax.block_until_ready(ssim_ref(img1, img2))

    assert np.isfinite(float(out))
    # Tolerance accommodates possible bf16 MXU passes at default matmul
    # precision (review asked to drop Precision.HIGHEST); with full-f32
    # lowering the observed error is ~1e-6.
    assert np.allclose(float(out), float(ref), rtol=5e-3, atol=5e-4), (
        float(out), float(ref))
    print("KERNEL_OK")
</pallas_src>

<mosaic_0001>
module attributes {stable_mosaic.version = 11 : i64} {
  func.func @kernel(%arg0: i32, %arg1: memref<8x16x16xf32, #tpu.memory_space<vmem>>, %arg2: memref<8x16x16xf32, #tpu.memory_space<vmem>>, %arg3: memref<16x16xf32, #tpu.memory_space<vmem>>, %arg4: memref<16x16xf32, #tpu.memory_space<vmem>>, %arg5: memref<1x1x1xf32, #tpu.memory_space<vmem>>) attributes {dimension_semantics = [#tpu.dimension_semantics<parallel>], iteration_bounds = array<i64: 1>, scalar_prefetch = 0 : i64, scratch_operands = 0 : i64, tpu.core_type = #tpu.core_type<tc>, window_params = [{transform_indices = @transform_0, window_bounds = array<i64: 8, 16, 16>}, {transform_indices = @transform_1, window_bounds = array<i64: 8, 16, 16>}, {pipeline_mode = #tpu.pipeline_mode<synchronous>, transform_indices = @transform_2, window_bounds = array<i64: 16, 16>}, {pipeline_mode = #tpu.pipeline_mode<synchronous>, transform_indices = @transform_3, window_bounds = array<i64: 16, 16>}, {transform_indices = @transform_4, window_bounds = array<i64: 1, 1, 1>}]} {
    %c0 = arith.constant 0 : index
    %c0_0 = arith.constant 0 : index
    %c0_1 = arith.constant 0 : index
    %0 = vector.load %arg1[%c0, %c0_0, %c0_1] : memref<8x16x16xf32, #tpu.memory_space<vmem>>, vector<8x16x16xf32>
    %c0_2 = arith.constant 0 : index
    %c0_3 = arith.constant 0 : index
    %c0_4 = arith.constant 0 : index
    %1 = vector.load %arg2[%c0_2, %c0_3, %c0_4] : memref<8x16x16xf32, #tpu.memory_space<vmem>>, vector<8x16x16xf32>
    %c0_5 = arith.constant 0 : index
    %c0_6 = arith.constant 0 : index
    %2 = vector.load %arg3[%c0_5, %c0_6] : memref<16x16xf32, #tpu.memory_space<vmem>>, vector<16x16xf32>
    %c0_7 = arith.constant 0 : index
    %c0_8 = arith.constant 0 : index
    %3 = vector.load %arg4[%c0_7, %c0_8] : memref<16x16xf32, #tpu.memory_space<vmem>>, vector<16x16xf32>
    %4 = vector.shape_cast %0 : vector<8x16x16xf32> to vector<128x16xf32>
    %cst = arith.constant dense<0.000000e+00> : vector<128x16xf32>
    %5 = tpu.matmul %4, %2, %cst {dimension_numbers = #tpu.dot_dimension_numbers<[1], [0], [0], [1], [0, 0, 1, 1], [], []>} : vector<128x16xf32>, vector<16x16xf32>, vector<128x16xf32> -> vector<128x16xf32>
    %6 = vector.shape_cast %5 : vector<128x16xf32> to vector<8x16x16xf32>
    %7 = tpu.transpose %6, [0, 2, 1] : vector<8x16x16xf32> -> vector<8x16x16xf32>
    %8 = vector.shape_cast %7 : vector<8x16x16xf32> to vector<128x16xf32>
    %cst_9 = arith.constant dense<0.000000e+00> : vector<128x16xf32>
    %9 = tpu.matmul %8, %3, %cst_9 {dimension_numbers = #tpu.dot_dimension_numbers<[1], [0], [0], [1], [0, 0, 1, 1], [], []>} : vector<128x16xf32>, vector<16x16xf32>, vector<128x16xf32> -> vector<128x16xf32>
    %10 = vector.shape_cast %9 : vector<128x16xf32> to vector<8x16x16xf32>
    %11 = vector.shape_cast %1 : vector<8x16x16xf32> to vector<128x16xf32>
    %cst_10 = arith.constant dense<0.000000e+00> : vector<128x16xf32>
    %12 = tpu.matmul %11, %2, %cst_10 {dimension_numbers = #tpu.dot_dimension_numbers<[1], [0], [0], [1], [0, 0, 1, 1], [], []>} : vector<128x16xf32>, vector<16x16xf32>, vector<128x16xf32> -> vector<128x16xf32>
    %13 = vector.shape_cast %12 : vector<128x16xf32> to vector<8x16x16xf32>
    %14 = tpu.transpose %13, [0, 2, 1] : vector<8x16x16xf32> -> vector<8x16x16xf32>
    %15 = vector.shape_cast %14 : vector<8x16x16xf32> to vector<128x16xf32>
    %cst_11 = arith.constant dense<0.000000e+00> : vector<128x16xf32>
    %16 = tpu.matmul %15, %3, %cst_11 {dimension_numbers = #tpu.dot_dimension_numbers<[1], [0], [0], [1], [0, 0, 1, 1], [], []>} : vector<128x16xf32>, vector<16x16xf32>, vector<128x16xf32> -> vector<128x16xf32>
    %17 = vector.shape_cast %16 : vector<128x16xf32> to vector<8x16x16xf32>
    %18 = arith.mulf %0, %0 : vector<8x16x16xf32>
    %19 = vector.shape_cast %18 : vector<8x16x16xf32> to vector<128x16xf32>
    %cst_12 = arith.constant dense<0.000000e+00> : vector<128x16xf32>
    %20 = tpu.matmul %19, %2, %cst_12 {dimension_numbers = #tpu.dot_dimension_numbers<[1], [0], [0], [1], [0, 0, 1, 1], [], []>} : vector<128x16xf32>, vector<16x16xf32>, vector<128x16xf32> -> vector<128x16xf32>
    %21 = vector.shape_cast %20 : vector<128x16xf32> to vector<8x16x16xf32>
    %22 = tpu.transpose %21, [0, 2, 1] : vector<8x16x16xf32> -> vector<8x16x16xf32>
    %23 = vector.shape_cast %22 : vector<8x16x16xf32> to vector<128x16xf32>
    %cst_13 = arith.constant dense<0.000000e+00> : vector<128x16xf32>
    %24 = tpu.matmul %23, %3, %cst_13 {dimension_numbers = #tpu.dot_dimension_numbers<[1], [0], [0], [1], [0, 0, 1, 1], [], []>} : vector<128x16xf32>, vector<16x16xf32>, vector<128x16xf32> -> vector<128x16xf32>
    %25 = vector.shape_cast %24 : vector<128x16xf32> to vector<8x16x16xf32>
    %26 = arith.mulf %1, %1 : vector<8x16x16xf32>
    %27 = vector.shape_cast %26 : vector<8x16x16xf32> to vector<128x16xf32>
    %cst_14 = arith.constant dense<0.000000e+00> : vector<128x16xf32>
    %28 = tpu.matmul %27, %2, %cst_14 {dimension_numbers = #tpu.dot_dimension_numbers<[1], [0], [0], [1], [0, 0, 1, 1], [], []>} : vector<128x16xf32>, vector<16x16xf32>, vector<128x16xf32> -> vector<128x16xf32>
    %29 = vector.shape_cast %28 : vector<128x16xf32> to vector<8x16x16xf32>
    %30 = tpu.transpose %29, [0, 2, 1] : vector<8x16x16xf32> -> vector<8x16x16xf32>
    %31 = vector.shape_cast %30 : vector<8x16x16xf32> to vector<128x16xf32>
    %cst_15 = arith.constant dense<0.000000e+00> : vector<128x16xf32>
    %32 = tpu.matmul %31, %3, %cst_15 {dimension_numbers = #tpu.dot_dimension_numbers<[1], [0], [0], [1], [0, 0, 1, 1], [], []>} : vector<128x16xf32>, vector<16x16xf32>, vector<128x16xf32> -> vector<128x16xf32>
    %33 = vector.shape_cast %32 : vector<128x16xf32> to vector<8x16x16xf32>
    %34 = arith.mulf %0, %1 : vector<8x16x16xf32>
    %35 = vector.shape_cast %34 : vector<8x16x16xf32> to vector<128x16xf32>
    %cst_16 = arith.constant dense<0.000000e+00> : vector<128x16xf32>
    %36 = tpu.matmul %35, %2, %cst_16 {dimension_numbers = #tpu.dot_dimension_numbers<[1], [0], [0], [1], [0, 0, 1, 1], [], []>} : vector<128x16xf32>, vector<16x16xf32>, vector<128x16xf32> -> vector<128x16xf32>
    %37 = vector.shape_cast %36 : vector<128x16xf32> to vector<8x16x16xf32>
    %38 = tpu.transpose %37, [0, 2, 1] : vector<8x16x16xf32> -> vector<8x16x16xf32>
    %39 = vector.shape_cast %38 : vector<8x16x16xf32> to vector<128x16xf32>
    %cst_17 = arith.constant dense<0.000000e+00> : vector<128x16xf32>
    %40 = tpu.matmul %39, %3, %cst_17 {dimension_numbers = #tpu.dot_dimension_numbers<[1], [0], [0], [1], [0, 0, 1, 1], [], []>} : vector<128x16xf32>, vector<16x16xf32>, vector<128x16xf32> -> vector<128x16xf32>
    %41 = vector.shape_cast %40 : vector<128x16xf32> to vector<8x16x16xf32>
    %42 = arith.mulf %10, %10 : vector<8x16x16xf32>
    %43 = arith.mulf %17, %17 : vector<8x16x16xf32>
    %44 = arith.mulf %10, %17 : vector<8x16x16xf32>
    %45 = arith.subf %25, %42 : vector<8x16x16xf32>
    %cst_18 = arith.constant 0.000000e+00 : f32
    %46 = vector.broadcast %cst_18 : f32 to vector<8x16x16xf32>
    %47 = arith.maximumf %45, %46 : vector<8x16x16xf32>
    %48 = arith.subf %33, %43 : vector<8x16x16xf32>
    %cst_19 = arith.constant 0.000000e+00 : f32
    %49 = vector.broadcast %cst_19 : f32 to vector<8x16x16xf32>
    %50 = arith.maximumf %48, %49 : vector<8x16x16xf32>
    %51 = arith.subf %41, %44 : vector<8x16x16xf32>
    %cst_20 = arith.constant 2.000000e+00 : f32
    %52 = vector.broadcast %cst_20 : f32 to vector<8x16x16xf32>
    %53 = arith.mulf %52, %44 : vector<8x16x16xf32>
    %cst_21 = arith.constant 9.99999974E-5 : f32
    %54 = vector.broadcast %cst_21 : f32 to vector<8x16x16xf32>
    %55 = arith.addf %53, %54 : vector<8x16x16xf32>
    %cst_22 = arith.constant 2.000000e+00 : f32
    %56 = vector.broadcast %cst_22 : f32 to vector<8x16x16xf32>
    %57 = arith.mulf %56, %51 : vector<8x16x16xf32>
    %cst_23 = arith.constant 8.99999984E-4 : f32
    %58 = vector.broadcast %cst_23 : f32 to vector<8x16x16xf32>
    %59 = arith.addf %57, %58 : vector<8x16x16xf32>
    %60 = arith.mulf %55, %59 : vector<8x16x16xf32>
    %61 = arith.addf %42, %43 : vector<8x16x16xf32>
    %cst_24 = arith.constant 9.99999974E-5 : f32
    %62 = vector.broadcast %cst_24 : f32 to vector<8x16x16xf32>
    %63 = arith.addf %61, %62 : vector<8x16x16xf32>
    %64 = arith.addf %47, %50 : vector<8x16x16xf32>
    %cst_25 = arith.constant 8.99999984E-4 : f32
    %65 = vector.broadcast %cst_25 : f32 to vector<8x16x16xf32>
    %66 = arith.addf %64, %65 : vector<8x16x16xf32>
    %67 = arith.mulf %63, %66 : vector<8x16x16xf32>
    %68 = tpu.reciprocal %67 : vector<8x16x16xf32> -> vector<8x16x16xf32>
    %69 = arith.mulf %60, %68 : vector<8x16x16xf32>
    %cst_26 = arith.constant 0.000000e+00 : f32
    %70 = vector.broadcast %cst_26 : f32 to vector<1x1x1xf32>
    %71 = vector.shape_cast %69 : vector<8x16x16xf32> to vector<1x8x16x16xf32>
    %cst_27 = arith.constant dense<0.000000e+00> : vector<1xf32>
    %72 = vector.multi_reduction <add>, %71, %cst_27 [1, 2, 3] : vector<1x8x16x16xf32> to vector<1xf32>
    %73 = vector.shape_cast %72 : vector<1xf32> to vector<1x1x1x1xf32>
    %74 = vector.extract %73[0, 0, 0, 0] : f32 from vector<1x1x1x1xf32>
    %75 = vector.broadcast %74 : f32 to vector<1x1x1xf32>
    %76 = arith.addf %70, %75 : vector<1x1x1xf32>
    %c0_28 = arith.constant 0 : index
    %c0_29 = arith.constant 0 : index
    %c0_30 = arith.constant 0 : index
    %77 = vector.load %arg5[%c0_28, %c0_29, %c0_30] : memref<1x1x1xf32, #tpu.memory_space<vmem>>, vector<1x1x1xf32>
    tpu.vector_store %arg5[%c0_28, %c0_29, %c0_30], %76 {strides = array<i32>} : memref<1x1x1xf32, #tpu.memory_space<vmem>>, vector<1x1x1xf32>,
    return
  }
  func.func @transform_0(%arg0: i32) -> (i32, i32, i32) {
    %c0_i32 = arith.constant 0 : i32
    %c0_i32_0 = arith.constant 0 : i32
    %c0_i32_1 = arith.constant 0 : i32
    return %arg0, %c0_i32, %c0_i32_0 : i32, i32, i32
  }
  func.func @transform_1(%arg0: i32) -> (i32, i32, i32) {
    %c0_i32 = arith.constant 0 : i32
    %c0_i32_0 = arith.constant 0 : i32
    %c0_i32_1 = arith.constant 0 : i32
    return %arg0, %c0_i32, %c0_i32_0 : i32, i32, i32
  }
  func.func @transform_2(%arg0: i32) -> (i32, i32) {
    %c0_i32 = arith.constant 0 : i32
    %c0_i32_0 = arith.constant 0 : i32
    %c0_i32_1 = arith.constant 0 : i32
    return %c0_i32, %c0_i32_0 : i32, i32
  }
  func.func @transform_3(%arg0: i32) -> (i32, i32) {
    %c0_i32 = arith.constant 0 : i32
    %c0_i32_0 = arith.constant 0 : i32
    %c0_i32_1 = arith.constant 0 : i32
    return %c0_i32, %c0_i32_0 : i32, i32
  }
  func.func @transform_4(%arg0: i32) -> (i32, i32, i32) {
    %c0_i32 = arith.constant 0 : i32
    %c0_i32_0 = arith.constant 0 : i32
    %c0_i32_1 = arith.constant 0 : i32
    return %arg0, %c0_i32, %c0_i32_0 : i32, i32, i32
  }
}

</mosaic_0001>

<bundles_post_ra>
// kernel: tpu_custom_call.1
= control target key start
LH: loop header
LB: loop body
LE: loop exit
PB: predicated region body
PF: predicated region fallthrough
CT: control target
= control target key end

     0   :  { %9 = vsyncpa [#allocation3], 0  ;;  %s5552_s0 = inlined_call_operand.hbm [shape: f32[8,16,16], index: 0, kind: input, shape index: {}]   ;;  %s5553_s1 = inlined_call_operand.hbm [shape: f32[8,16,16], index: 1, kind: input, shape index: {}]   ;;  %s5554_s2 = inlined_call_operand.hbm [shape: f32[16,16], index: 2, kind: input, shape index: {}]   ;;  %s5555_s3 = inlined_call_operand.hbm [shape: f32[16,16], index: 3, kind: input, shape index: {}]   ;;  %s5556_s4 = inlined_call_operand.hbm [shape: f32[1,1,1], index: 4, kind: output, shape index: {}]  }
   0x1   :  { %10 = vsyncpa [#allocation6], 0 }
   0x2   :  { %11 = vsyncpa [#allocation9], 0 }
   0x3   :  { %12 = vsyncpa [#allocation4], 0  ;;  %s4569_s15 = smov [#allocation5]   ;;  %s4570_s17 = smov [#allocation2]  }
   0x4   :  { %s30_s16 = sshll.u32 %s4569_s15, 4  ;;  %s18_s18 = sshll.u32 %s4570_s17, 4  ;;  %s31_s16 = int_to_ptr.vmem [resolvable:$true] %s30_s16  ;;  %s4601_s18 = int_to_ptr.vmem [resolvable:$true] %s18_s18 }
   0x5   :  { %s4451_s21 = scalar_lea.hbm %s5553_s1, 2048 }
   0x6   :  { %p4452_p0 = scmp.ne.s32.totalorder %s5553_s1, %s4451_s21  ;;  %p4455_p1 = scmp.lt.u32.totalorder %s4451_s21, %s5553_s1 }
   0x8   :  { %p4457_p2 = pnand %p4455_p1, %p4452_p0 }
   0xa   :  { %4460 = shalt.err (!%p4457_p2)
}
   0xb   :  { %s4461_s26 = scalar_lea.vmem %s31_s16, 2048  ;;  %p4466_p4 = scmp.lt.s32.totalorder %s31_s16, %s31_s16 }
   0xc   :  { %p4462_p3 = scmp.ne.s32.totalorder %s31_s16, %s4461_s26  ;;  %p4467_p5 = scmp.lt.s32.totalorder %s4461_s26, %s4461_s26 }
   0xe   :  { %p4468_p6 = por %p4467_p5, %p4466_p4 }
  0x10   :  { %p4469_p7 = pnand %p4468_p6, %p4462_p3 }
  0x12   :  { %4472 = shalt.err (!%p4469_p7)
}
  0x13   :  { %s4571_s27 = smov 128   ;;  %s4572_s28 = smov 8  }
  0x14   :  { %36 = dma.hbm_to_vmem [thread:$0]  %s5553_s1, 2048, %s31_s16, [#allocation6], %s4571_s27, %s4571_s27, %s4572_s28  }
  0x15   :  { %s4473_s7 = scalar_lea.hbm %s5552_s0, 2048 }
  0x16   :  { %p4474_p8 = scmp.ne.s32.totalorder %s5552_s0, %s4473_s7  ;;  %p4477_p9 = scmp.lt.u32.totalorder %s4473_s7, %s5552_s0 }
  0x18   :  { %p4479_p10 = pnand %p4477_p9, %p4474_p8 }
  0x1a   :  { %4482 = shalt.err (!%p4479_p10)
}
  0x1b   :  { %s4483_s12 = scalar_lea.vmem %s4601_s18, 2048  ;;  %p4488_p12 = scmp.lt.s32.totalorder %s4601_s18, %s4601_s18 }
  0x1c   :  { %p4484_p11 = scmp.ne.s32.totalorder %s4601_s18, %s4483_s12  ;;  %p4489_p13 = scmp.lt.s32.totalorder %s4483_s12, %s4483_s12 }
  0x1e   :  { %p4490_p0 = por %p4489_p13, %p4488_p12 }
  0x20   :  { %p4491_p1 = pnand %p4490_p0, %p4484_p11 }
  0x22   :  { %4494 = shalt.err (!%p4491_p1)
}
  0x23   :  { %24 = dma.hbm_to_vmem [thread:$0]  %s5552_s0, 2048, %s4601_s18, [#allocation3], %s4571_s27, %s4571_s27, %s4572_s28  }
  0x24   :  { %s4573_s14 = smov [#allocation7]   ;;  %s4574_s16 = smov [#allocation8]  }
  0x25   :  { %s42_s15 = sshll.u32 %s4573_s14, 4  ;;  %s54_s17 = sshll.u32 %s4574_s16, 4  ;;  %s43_s15 = int_to_ptr.vmem [resolvable:$true] %s42_s15  ;;  %s4638_s17 = int_to_ptr.vmem [resolvable:$true] %s54_s17 }
  0x26   :  { %s4495_s21 = scalar_lea.hbm %s5554_s2, 256 }
  0x27   :  { %p4496_p2 = scmp.ne.s32.totalorder %s5554_s2, %s4495_s21  ;;  %p4499_p3 = scmp.lt.u32.totalorder %s4495_s21, %s5554_s2 }
  0x29   :  { %p4501_p4 = pnand %p4499_p3, %p4496_p2 }
  0x2b   :  { %4504 = shalt.err (!%p4501_p4)
}
  0x2c   :  { %s4505_s0 = scalar_lea.vmem %s43_s15, 256  ;;  %p4510_p6 = scmp.lt.s32.totalorder %s43_s15, %s43_s15 }
  0x2d   :  { %p4506_p5 = scmp.ne.s32.totalorder %s43_s15, %s4505_s0  ;;  %p4511_p7 = scmp.lt.s32.totalorder %s4505_s0, %s4505_s0 }
  0x2f   :  { %p4512_p8 = por %p4511_p7, %p4510_p6 }
  0x31   :  { %p4513_p9 = pnand %p4512_p8, %p4506_p5 }
  0x33   :  { %4516 = shalt.err (!%p4513_p9)
}
  0x34   :  { %48 = dma.hbm_to_vmem [thread:$0]  %s5554_s2, 256, %s43_s15, [#allocation6], %s4571_s27, %s4571_s27, %s4572_s28  }
  0x35   :  { %s4517_s5 = scalar_lea.hbm %s5555_s3, 256 }
  0x36   :  { %p4518_p10 = scmp.ne.s32.totalorder %s5555_s3, %s4517_s5  ;;  %p4521_p11 = scmp.lt.u32.totalorder %s4517_s5, %s5555_s3 }
  0x38   :  { %p4523_p12 = pnand %p4521_p11, %p4518_p10 }
  0x3a   :  { %4526 = shalt.err (!%p4523_p12)
}
  0x3b   :  { %s4527_s10 = scalar_lea.vmem %s4638_s17, 256  ;;  %p4532_p0 = scmp.lt.s32.totalorder %s4638_s17, %s4638_s17 }
  0x3c   :  { %p4528_p13 = scmp.ne.s32.totalorder %s4638_s17, %s4527_s10  ;;  %p4533_p1 = scmp.lt.s32.totalorder %s4527_s10, %s4527_s10 }
  0x3e   :  { %p4534_p2 = por %p4533_p1, %p4532_p0 }
  0x40   :  { %p4535_p3 = pnand %p4534_p2, %p4528_p13 }
  0x42   :  { %4538 = shalt.err (!%p4535_p3)
}
  0x43   :  { %60 = dma.hbm_to_vmem [thread:$0]  %s5555_s3, 256, %s4638_s17, [#allocation9], %s4571_s27, %s4571_s27, %s4572_s28  }
  0x44   :  { %4561 = dma.done.wait [#allocation3], 2048  }
  0x45   :  { %4562 = vsyncadd [#allocation3], 4294965248 }
  0x46   :  { %4563 = dma.done.wait [#allocation6], 2304  }
  0x47   :  { %4564 = vsyncadd [#allocation6], 4294964992 }
  0x48   :  { %4565 = dma.done.wait [#allocation9], 256  }
  0x49   :  { %4566 = vsyncadd [#allocation9], 4294967040  ;;  %vm109_vm0 = vcmask 130048   ;;  %v105_v0 = vld [vmem:[#allocation7] sm:$0xff]  ;;  %v106_v1 = vld [vmem:[#allocation7 + $0x8] sm:$0xff]  ;;  %s4575_s3 = smov [#allocation10]  }
  0x4a   :  { %v4675_v2 = vld [vmem:[#allocation2] sm:$0xff]  ;;  %v4677_v3 = vpack.c.bf16 %v106_v1, %v105_v0  ;;  %v4681_v4 = vld [vmem:[#allocation2 + $0x8] sm:$0xff]  ;;  %v4692_v7 = vld [vmem:[#allocation2 + $0x10] sm:$0xff]  ;;  %s3738_s27 = sshll.u32 %s4575_s3, 4  ;;  %vm3730_vm1 = vcmask 0   ;;  %s3739_s27 = int_to_ptr.vmem [resolvable:$true] %s3738_s27 }
  0x4b   :  { %4093 = vmatprep.mubr.msk.f32.mxu0 %vm109_vm0, %v4675_v2  ;;  %v4683_v5 = vld [vmem:[#allocation5 + $0x8] sm:$0xff]  ;;  %v4694_v8 = vld [vmem:[#allocation2 + $0x18] sm:$0xff]  ;;  %v4696_v9 = vld [vmem:[#allocation2 + $0x20] sm:$0xff]  ;;  %v1394_v51 = vmul.f32 %v4675_v2, %v4675_v2  ;;  %v1395_v52 = vmul.f32 %v4681_v4, %v4681_v4  ;;  %v1396_v53 = vmul.f32 %v4692_v7, %v4692_v7  ;;  %s4539_s12 = scalar_lea.vmem %s3739_s27, 16  ;;  %s4543_s1 = scalar_lea.vmem %s3739_s27, 32 }
  0x4c   :  { %v4687_v6 = vmul.f32 %v4683_v5, %v4681_v4  ;;  %4370 = vmatprep.subr.bf16.mxu0 %v4677_v3  ;;  %v4698_v10 = vld [vmem:[#allocation2 + $0x28] sm:$0xff]  ;;  %v4700_v11 = vld [vmem:[#allocation5] sm:$0xff]  ;;  %v4704_v12 = vld [vmem:[#allocation2 + $0x30] sm:$0xff]  ;;  %v1397_v54 = vmul.f32 %v4694_v8, %v4694_v8  ;;  %v1398_v55 = vmul.f32 %v4696_v9, %v4696_v9  ;;  %p4540_p4 = scmp.ne.s32.totalorder %s3739_s27, %s4539_s12  ;;  %p4544_p5 = scmp.lt.s32.totalorder %s3739_s27, %s3739_s27 }
  0x4d   :  { %4372 = vmatpush3.bf16.msra.mxu0 %v4677_v3  ;;  %v4706_v13 = vld [vmem:[#allocation2 + $0x38] sm:$0xff]  ;;  %v4710_v14 = vmul.f32 %v4700_v11, %v4675_v2  ;;  %v4712_v15 = vld [vmem:[#allocation5 + $0x10] sm:$0xff]  ;;  %v4719_v17 = vld [vmem:[#allocation2 + $0x40] sm:$0xff]  ;;  %v1399_v56 = vmul.f32 %v4698_v10, %v4698_v10  ;;  %v1400_v57 = vmul.f32 %v4704_v12, %v4704_v12  ;;  %p4545_p6 = scmp.lt.s32.totalorder %s4543_s1, %s4539_s12 }
  0x4e   :  { %4378 = vmatprep.subr.bf16.mxu0 %v4677_v3  ;;  %v4714_v16 = vld [vmem:[#allocation5 + $0x18] sm:$0xff]  ;;  %v4721_v18 = vld [vmem:[#allocation2 + $0x48] sm:$0xff]  ;;  %v4725_v19 = vmul.f32 %v4712_v15, %v4692_v7  ;;  %v4731_v21 = vld [vmem:[#allocation5 + $0x20] sm:$0xff]  ;;  %v1401_v58 = vmul.f32 %v4706_v13, %v4706_v13  ;;  %v1402_v59 = vmul.f32 %v4719_v17, %v4719_v17 }
  0x4f   :  { %v4729_v20 = vmul.f32 %v4714_v16, %v4694_v8  ;;  %v4733_v22 = vld [vmem:[#allocation5 + $0x28] sm:$0xff]  ;;  %v4735_v23 = vld [vmem:[#allocation2 + $0x50] sm:$0xff]  ;;  %v4737_v24 = vld [vmem:[#allocation2 + $0x58] sm:$0xff]  ;;  %v4742_v25 = vmul.f32 %v4731_v21, %v4696_v9  ;;  %v1403_v60 = vmul.f32 %v4721_v18, %v4721_v18  ;;  %p4546_p7 = por %p4545_p6, %p4544_p5 }
  0x50   :  { %4094 = vmatmul.mubr.msk.f32.vlgmr.msra.gmra.mrb[0].mxu0 %vm109_vm0, %v4681_v4  ;;  %v4746_v26 = vmul.f32 %v4733_v22, %v4698_v10  ;;  %v4748_v27 = vld [vmem:[#allocation5 + $0x30] sm:$0xff]  ;;  %v4750_v28 = vld [vmem:[#allocation5 + $0x38] sm:$0xff]  ;;  %v4752_v29 = vld [vmem:[#allocation2 + $0x60] sm:$0xff]  ;;  %v1404_v61 = vmul.f32 %v4735_v23, %v4735_v23  ;;  %v1405_v62 = vmul.f32 %v4737_v24, %v4737_v24  ;;  %v2052_v4 = vmul.f32 %v4700_v11, %v4700_v11 }
  0x51   :  { %4380 = vmatpush3.bf16.msra.mxu0 %v4677_v3  ;;  %4096 = vmatprep.mubr.msk.f32.mxu0 %vm109_vm0, %v4692_v7  ;;  %v4756_v30 = vmul.f32 %v4748_v27, %v4704_v12  ;;  %v4760_v31 = vmul.f32 %v4750_v28, %v4706_v13  ;;  %v4762_v32 = vld [vmem:[#allocation5 + $0x40] sm:$0xff]  ;;  %v4764_v33 = vld [vmem:[#allocation5 + $0x48] sm:$0xff]  ;;  %v4778_v37 = vld [vmem:[#allocation5 + $0x50] sm:$0xff]  ;;  %v1406_v63 = vmul.f32 %v4752_v29, %v4752_v29  ;;  %p4547_p8 = pnand %p4546_p7, %p4540_p4 }
  0x52   :  { %4386 = vmatprep.subr.bf16.mxu0 %v4677_v3  ;;  %v4768_v34 = vld [vmem:[#allocation2 + $0x68] sm:$0xff]  ;;  %v4772_v35 = vmul.f32 %v4762_v32, %v4719_v17  ;;  %v4776_v36 = vmul.f32 %v4764_v33, %v4721_v18  ;;  %v4780_v38 = vld [vmem:[#allocation5 + $0x58] sm:$0xff]  ;;  %v4784_v39 = vld [vmem:[#allocation2 + $0x70] sm:$0xff]  ;;  %v4788_v40 = vmul.f32 %v4778_v37, %v4735_v23  ;;  %v2053_v7 = vmul.f32 %v4683_v5, %v4683_v5 }
  0x53   :  { %v4792_v41 = vmul.f32 %v4780_v38, %v4737_v24  ;;  %v4794_v42 = vld [vmem:[#allocation5 + $0x60] sm:$0xff]  ;;  %v4796_v43 = vld [vmem:[#allocation5 + $0x68] sm:$0xff]  ;;  %v4798_v44 = vld [vmem:[#allocation2 + $0x78] sm:$0xff]  ;;  %v1407_v0 = vmul.f32 %v4768_v34, %v4768_v34  ;;  %v1408_v1 = vmul.f32 %v4784_v39, %v4784_v39 }
  0x54   :  { %4097 = vmatmul.mubr.msk.f32.gmra.mrb[2].mxu0 %vm109_vm0, %v4694_v8  ;;  %v4802_v45 = vmul.f32 %v4794_v42, %v4752_v29  ;;  %v4806_v46 = vmul.f32 %v4796_v43, %v4768_v34  ;;  %v4808_v47 = vld [vmem:[#allocation5 + $0x70] sm:$0xff]  ;;  %v4810_v48 = vld [vmem:[#allocation5 + $0x78] sm:$0xff]  ;;  %v1409_v2 = vmul.f32 %v4798_v44, %v4798_v44  ;;  %v2054_v8 = vmul.f32 %v4712_v15, %v4712_v15 }
  0x55   :  { %4099 = vmatprep.mubr.msk.f32.mxu0 %vm109_vm0, %v4696_v9  ;;  %v4814_v49 = vmul.f32 %v4808_v47, %v4784_v39  ;;  %v4818_v50 = vmul.f32 %v4810_v48, %v4798_v44  ;;  %v2055_v9 = vmul.f32 %v4714_v16, %v4714_v16 }
  0x58   :  { %4100 = vmatmul.mubr.msk.f32.gmra.mrb[4].mxu0 %vm109_vm0, %v4698_v10  ;;  %v2056_v10 = vmul.f32 %v4731_v21, %v4731_v21 }
  0x59   :  { %4102 = vmatprep.mubr.msk.f32.mxu0 %vm109_vm0, %v4704_v12  ;;  %v2059_v12 = vmul.f32 %v4750_v28, %v4750_v28 }
  0x5c   :  { %4103 = vmatmul.mubr.msk.f32.gmra.mrb[6].mxu0 %vm109_vm0, %v4706_v13  ;;  %v2061_v13 = vmul.f32 %v4764_v33, %v4764_v33 }
  0x5d   :  { %4105 = vmatprep.mubr.msk.f32.mxu0 %vm109_vm0, %v4719_v17  ;;  %v2064_v17 = vmul.f32 %v4794_v42, %v4794_v42 }
  0x60   :  { %4106 = vmatmul.mubr.msk.f32.gmra.mrb[8].mxu0 %vm109_vm0, %v4721_v18  ;;  %v2065_v18 = vmul.f32 %v4796_v43, %v4796_v43 }
  0x61   :  { %4108 = vmatprep.mubr.msk.f32.mxu0 %vm109_vm0, %v4735_v23 }
  0x64   :  { %4109 = vmatmul.mubr.msk.f32.gmra.mrb[10].mxu0 %vm109_vm0, %v4737_v24 }
  0x65   :  { %4111 = vmatprep.mubr.msk.f32.mxu0 %vm109_vm0, %v4752_v29 }
  0x68   :  { %4112 = vmatmul.mubr.msk.f32.gmra.mrb[12].mxu0 %vm109_vm0, %v4768_v34 }
  0x69   :  { %4114 = vmatprep.mubr.msk.f32.mxu0 %vm109_vm0, %v4784_v39 }
  0x6c   :  { %4115 = vmatmul.mubr.msk.f32.gmra.mrb[14].mxu0 %vm109_vm0, %v4798_v44 }
  0x6d   :  { %4149 = vmatprep.mubr.msk.f32.mxu0 %vm109_vm0, %v4700_v11  ;;  %v2058_v11 = vmul.f32 %v4748_v27, %v4748_v27 }
  0x70   :  { %4150 = vmatmul.mubr.msk.f32.vlgmr.msra.gmra.mrb[16].mxu0 %vm109_vm0, %v4683_v5  ;;  %v2057_v5 = vmul.f32 %v4733_v22, %v4733_v22 }
  0x71   :  { %4388 = vmatpush3.bf16.msra.mxu0 %v4677_v3  ;;  %4152 = vmatprep.mubr.msk.f32.mxu0 %vm109_vm0, %v4712_v15  ;;  %v2062_v15 = vmul.f32 %v4778_v37, %v4778_v37 }
  0x72   :  { %4394 = vmatprep.subr.bf16.mxu0 %v4677_v3 }
  0x74   :  { %4153 = vmatmul.mubr.msk.f32.gmra.mrb[18].mxu0 %vm109_vm0, %v4714_v16  ;;  %v2063_v16 = vmul.f32 %v4780_v38, %v4780_v38 }
  0x75   :  { %4155 = vmatprep.mubr.msk.f32.mxu0 %vm109_vm0, %v4731_v21  ;;  %v2066_v21 = vmul.f32 %v4808_v47, %v4808_v47 }
  0x78   :  { %4156 = vmatmul.mubr.msk.f32.gmra.mrb[20].mxu0 %vm109_vm0, %v4733_v22  ;;  %v2067_v22 = vmul.f32 %v4810_v48, %v4810_v48 }
  0x79   :  { %4158 = vmatprep.mubr.msk.f32.mxu0 %vm109_vm0, %v4748_v27 }
  0x7c   :  { %4159 = vmatmul.mubr.msk.f32.gmra.mrb[22].mxu0 %vm109_vm0, %v4750_v28 }
  0x7d   :  { %4161 = vmatprep.mubr.msk.f32.mxu0 %vm109_vm0, %v4762_v32 }
  0x80   :  { %4162 = vmatmul.mubr.msk.f32.gmra.mrb[24].mxu0 %vm109_vm0, %v4764_v33 }
  0x81   :  { %4164 = vmatprep.mubr.msk.f32.mxu0 %vm109_vm0, %v4778_v37 }
  0x84   :  { %4165 = vmatmul.mubr.msk.f32.gmra.mrb[26].mxu0 %vm109_vm0, %v4780_v38 }
  0x85   :  { %4167 = vmatprep.mubr.msk.f32.mxu0 %vm109_vm0, %v4794_v42 }
  0x88   :  { %4168 = vmatmul.mubr.msk.f32.gmra.mrb[28].mxu0 %vm109_vm0, %v4796_v43 }
  0x89   :  { %4170 = vmatprep.mubr.msk.f32.mxu0 %vm109_vm0, %v4808_v47 }
  0x8c   :  { %4171 = vmatmul.mubr.msk.f32.gmra.mrb[30].mxu0 %vm109_vm0, %v4810_v48 }
  0x8d   :  { %4205 = vmatprep.mubr.msk.f32.mxu0 %vm109_vm0, %v1394_v51 }
  0x90   :  { %4206 = vmatmul.mubr.msk.f32.vlgmr.msra.gmra.mrb[32].mxu0 %vm109_vm0, %v1395_v52 }
  0x91   :  { %4396 = vmatpush3.bf16.msra.mxu0 %v4677_v3  ;;  %4208 = vmatprep.mubr.msk.f32.mxu0 %vm109_vm0, %v1396_v53 }
  0x92   :  { %4402 = vmatprep.subr.bf16.mxu0 %v4677_v3 }
  0x94   :  { %4209 = vmatmul.mubr.msk.f32.gmra.mrb[34].mxu0 %vm109_vm0, %v1397_v54 }
  0x95   :  { %4211 = vmatprep.mubr.msk.f32.mxu0 %vm109_vm0, %v1398_v55 }
  0x98   :  { %4212 = vmatmul.mubr.msk.f32.gmra.mrb[36].mxu0 %vm109_vm0, %v1399_v56 }
  0x99   :  { %4214 = vmatprep.mubr.msk.f32.mxu0 %vm109_vm0, %v1400_v57 }
  0x9c   :  { %4215 = vmatmul.mubr.msk.f32.gmra.mrb[38].mxu0 %vm109_vm0, %v1401_v58 }
  0x9d   :  { %4217 = vmatprep.mubr.msk.f32.mxu0 %vm109_vm0, %v1402_v59 }
  0xa0   :  { %4218 = vmatmul.mubr.msk.f32.gmra.mrb[40].mxu0 %vm109_vm0, %v1403_v60 }
  0xa1   :  { %4220 = vmatprep.mubr.msk.f32.mxu0 %vm109_vm0, %v1404_v61 }
  0xa4   :  { %4221 = vmatmul.mubr.msk.f32.gmra.mrb[42].mxu0 %vm109_vm0, %v1405_v62 }
  0xa5   :  { %4223 = vmatprep.mubr.msk.f32.mxu0 %vm109_vm0, %v1406_v63 }
  0xa8   :  { %4224 = vmatmul.mubr.msk.f32.gmra.mrb[44].mxu0 %vm109_vm0, %v1407_v0 }
  0xa9   :  { %4226 = vmatprep.mubr.msk.f32.mxu0 %vm109_vm0, %v1408_v1 }
  0xac   :  { %4227 = vmatmul.mubr.msk.f32.gmra.mrb[46].mxu0 %vm109_vm0, %v1409_v2 }
  0xad   :  { %4261 = vmatprep.mubr.msk.f32.mxu0 %vm109_vm0, %v2052_v4 }
  0xb0   :  { %4262 = vmatmul.mubr.msk.f32.vlgmr.msra.gmra.mrb[48].mxu0 %vm109_vm0, %v2053_v7 }
  0xb1   :  { %4404 = vmatpush3.bf16.msra.mxu0 %v4677_v3  ;;  %4264 = vmatprep.mubr.msk.f32.mxu0 %vm109_vm0, %v2054_v8  ;;  %v2060_v3 = vmul.f32 %v4762_v32, %v4762_v32 }
  0xb4   :  { %4265 = vmatmul.mubr.msk.f32.gmra.mrb[50].mxu0 %vm109_vm0, %v2055_v9 }
  0xb5   :  { %4267 = vmatprep.mubr.msk.f32.mxu0 %vm109_vm0, %v2056_v10 }
  0xb8   :  { %4268 = vmatmul.mubr.msk.f32.gmra.mrb[52].mxu0 %vm109_vm0, %v2057_v5 }
  0xb9   :  { %4270 = vmatprep.mubr.msk.f32.mxu0 %vm109_vm0, %v2058_v11 }
  0xbc   :  { %4271 = vmatmul.mubr.msk.f32.gmra.mrb[54].mxu0 %vm109_vm0, %v2059_v12 }
  0xbd   :  { %4273 = vmatprep.mubr.msk.f32.mxu0 %vm109_vm0, %v2060_v3 }
  0xc0   :  { %4274 = vmatmul.mubr.msk.f32.gmra.mrb[56].mxu0 %vm109_vm0, %v2061_v13 }
  0xc1   :  { %4276 = vmatprep.mubr.msk.f32.mxu0 %vm109_vm0, %v2062_v15 }
  0xc4   :  { %4277 = vmatmul.mubr.msk.f32.gmra.mrb[58].mxu0 %vm109_vm0, %v2063_v16 }
  0xc5   :  { %4279 = vmatprep.mubr.msk.f32.mxu0 %vm109_vm0, %v2064_v17 }
  0xc8   :  { %4280 = vmatmul.mubr.msk.f32.gmra.mrb[60].mxu0 %vm109_vm0, %v2065_v18 }
  0xc9   :  { %4282 = vmatprep.mubr.msk.f32.mxu0 %vm109_vm0, %v2066_v21 }
  0xcc   :  { %4283 = vmatmul.mubr.msk.f32.gmra.mrb[62].mxu0 %vm109_vm0, %v2067_v22 }
  0xcd   :  { %4317 = vmatprep.mubr.msk.f32.mxu0 %vm109_vm0, %v4710_v14  ;;  %v107_v14 = vld [vmem:[#allocation8] sm:$0xff] }
  0xd0   :  { %4318 = vmatmul.mubr.msk.f32.vlgmr.msra.gmra.mrb[64].mxu0 %vm109_vm0, %v4687_v6 }
  0xd1   :  { %4320 = vmatprep.mubr.msk.f32.mxu0 %vm109_vm0, %v4725_v19  ;;  %v108_v19 = vld [vmem:[#allocation8 + $0x8] sm:$0xff] }
  0xd2   :  { %v5007_v23 = vpack.c.bf16 %v108_v19, %v107_v14 }
  0xd4   :  { %4321 = vmatmul.mubr.msk.f32.gmra.mrb[66].mxu0 %vm109_vm0, %v4729_v20  ;;  %4374 = vmatprep.subr.bf16.mxu1 %v5007_v23 }
  0xd5   :  { %4323 = vmatprep.mubr.msk.f32.mxu0 %vm109_vm0, %v4742_v25  ;;  %4376 = vmatpush3.bf16.msra.mxu1 %v5007_v23 }
  0xd6   :  { %4382 = vmatprep.subr.bf16.mxu1 %v5007_v23 }
  0xd8   :  { %4324 = vmatmul.mubr.msk.f32.gmra.mrb[68].mxu0 %vm109_vm0, %v4746_v26 }
  0xd9   :  { %4326 = vmatprep.mubr.msk.f32.mxu0 %vm109_vm0, %v4756_v30 }
  0xdc   :  { %4327 = vmatmul.mubr.msk.f32.gmra.mrb[70].mxu0 %vm109_vm0, %v4760_v31 }
  0xdd   :  { %4329 = vmatprep.mubr.msk.f32.mxu0 %vm109_vm0, %v4772_v35 }
  0xe0   :  { %4330 = vmatmul.mubr.msk.f32.gmra.mrb[72].mxu0 %vm109_vm0, %v4776_v36 }
  0xe1   :  { %4332 = vmatprep.mubr.msk.f32.mxu0 %vm109_vm0, %v4788_v40 }
  0xe4   :  { %4333 = vmatmul.mubr.msk.f32.gmra.mrb[74].mxu0 %vm109_vm0, %v4792_v41 }
  0xe5   :  { %4335 = vmatprep.mubr.msk.f32.mxu0 %vm109_vm0, %v4802_v45 }
  0xe8   :  { %4336 = vmatmul.mubr.msk.f32.gmra.mrb[76].mxu0 %vm109_vm0, %v4806_v46 }
  0xe9   :  { %4338 = vmatprep.mubr.msk.f32.mxu0 %vm109_vm0, %v4814_v49 }
  0xec   :  { %4339 = vmatmul.mubr.msk.f32.gmra.mrb[78].mxu0 %vm109_vm0, %v4818_v50 }
 0x123   :  { %v4095_v6 = vpop.f32.mrb[0].mxu0 }
 0x124   :  { %v224_v20 = vpop.f32.mrb[1].mxu0 }
 0x125   :  { %303 = vxpose.xlu0.b32.start [1/2] (short) (narrow) %v224_v20, 16 }
 0x127   :  { %v4098_v24 = vpop.f32.mrb[2].mxu0 }
 0x128   :  { %v234_v25 = vpop.f32.mrb[3].mxu0 }
 0x129   :  { %304 = vxpose.xlu0.b32.end [2/2] (short) (narrow) %v4095_v6, 16  ;;  %335 = vxpose.xlu1.b32.start [1/2] (short) (narrow) %v234_v25, 16 }
 0x12b   :  { %v4101_v26 = vpop.f32.mrb[4].mxu0 }
 0x12c   :  { %v244_v27 = vpop.f32.mrb[5].mxu0 }
 0x12d   :  { %336 = vxpose.xlu1.b32.end [2/2] (short) (narrow) %v4098_v24, 16  ;;  %367 = vxpose.xlu0.b32.start [1/2] (short) (narrow) %v244_v27, 16 }
 0x12f   :  { %v4104_v28 = vpop.f32.mrb[6].mxu0 }
 0x130   :  { %v254_v29 = vpop.f32.mrb[7].mxu0 }
 0x131   :  { %368 = vxpose.xlu0.b32.end [2/2] (short) (narrow) %v4101_v26, 16  ;;  %399 = vxpose.xlu1.b32.start [1/2] (short) (narrow) %v254_v29, 16 }
 0x133   :  { %v4107_v30 = vpop.f32.mrb[8].mxu0 }
 0x134   :  { %v264_v31 = vpop.f32.mrb[9].mxu0 }
 0x135   :  { %400 = vxpose.xlu1.b32.end [2/2] (short) (narrow) %v4104_v28, 16  ;;  %431 = vxpose.xlu0.b32.start [1/2] (short) (narrow) %v264_v31, 16 }
 0x137   :  { %v4110_v32 = vpop.f32.mrb[10].mxu0 }
 0x138   :  { %v274_v33 = vpop.f32.mrb[11].mxu0 }
 0x139   :  { %432 = vxpose.xlu0.b32.end [2/2] (short) (narrow) %v4107_v30, 16  ;;  %463 = vxpose.xlu1.b32.start [1/2] (short) (narrow) %v274_v33, 16 }
 0x13b   :  { %v4113_v34 = vpop.f32.mrb[12].mxu0 }
 0x13c   :  { %v284_v35 = vpop.f32.mrb[13].mxu0 }
 0x13d   :  { %464 = vxpose.xlu1.b32.end [2/2] (short) (narrow) %v4110_v32, 16  ;;  %495 = vxpose.xlu0.b32.start [1/2] (short) (narrow) %v284_v35, 16 }
 0x13f   :  { %v4116_v36 = vpop.f32.mrb[14].mxu0 }
 0x140   :  { %v294_v37 = vpop.f32.mrb[15].mxu0 }
 0x141   :  { %496 = vxpose.xlu0.b32.end [2/2] (short) (narrow) %v4113_v34, 16  ;;  %527 = vxpose.xlu1.b32.start [1/2] (short) (narrow) %v294_v37, 16 }
 0x143   :  { %v4151_v38 = vpop.f32.mrb[16].mxu0 }
 0x144   :  { %v866_v39 = vpop.f32.mrb[17].mxu0 }
 0x145   :  { %528 = vxpose.xlu1.b32.end [2/2] (short) (narrow) %v4116_v36, 16  ;;  %945 = vxpose.xlu0.b32.start [1/2] (short) (narrow) %v866_v39, 16 }
 0x147   :  { %v4154_v40 = vpop.f32.mrb[18].mxu0 }
 0x148   :  { %v876_v41 = vpop.f32.mrb[19].mxu0 }
 0x149   :  { %946 = vxpose.xlu0.b32.end [2/2] (short) (narrow) %v4151_v38, 16  ;;  %977 = vxpose.xlu1.b32.start [1/2] (short) (narrow) %v876_v41, 16 }
 0x14b   :  { %v4157_v42 = vpop.f32.mrb[20].mxu0 }
 0x14c   :  { %v886_v43 = vpop.f32.mrb[21].mxu0 }
 0x14d   :  { %978 = vxpose.xlu1.b32.end [2/2] (short) (narrow) %v4154_v40, 16  ;;  %1009 = vxpose.xlu0.b32.start [1/2] (short) (narrow) %v886_v43, 16 }
 0x14f   :  { %v4160_v44 = vpop.f32.mrb[22].mxu0 }
 0x150   :  { %v896_v45 = vpop.f32.mrb[23].mxu0 }
 0x151   :  { %1010 = vxpose.xlu0.b32.end [2/2] (short) (narrow) %v4157_v42, 16  ;;  %1041 = vxpose.xlu1.b32.start [1/2] (short) (narrow) %v896_v45, 16 }
 0x153   :  { %v4163_v46 = vpop.f32.mrb[24].mxu0 }
 0x154   :  { %v906_v47 = vpop.f32.mrb[25].mxu0 }
 0x155   :  { %1042 = vxpose.xlu1.b32.end [2/2] (short) (narrow) %v4160_v44, 16  ;;  %1073 = vxpose.xlu0.b32.start [1/2] (short) (narrow) %v906_v47, 16 }
 0x157   :  { %v4166_v48 = vpop.f32.mrb[26].mxu0 }
 0x158   :  { %v916_v49 = vpop.f32.mrb[27].mxu0 }
 0x159   :  { %1074 = vxpose.xlu0.b32.end [2/2] (short) (narrow) %v4163_v46, 16  ;;  %1105 = vxpose.xlu1.b32.start [1/2] (short) (narrow) %v916_v49, 16 }
 0x15b   :  { %v4169_v50 = vpop.f32.mrb[28].mxu0 }
 0x15c   :  { %v926_v51 = vpop.f32.mrb[29].mxu0 }
 0x15d   :  { %1106 = vxpose.xlu1.b32.end [2/2] (short) (narrow) %v4166_v48, 16  ;;  %1137 = vxpose.xlu0.b32.start [1/2] (short) (narrow) %v926_v51, 16 }
 0x15f   :  { %v4172_v52 = vpop.f32.mrb[30].mxu0 }
 0x160   :  { %v936_v53 = vpop.f32.mrb[31].mxu0 }
 0x161   :  { %1138 = vxpose.xlu0.b32.end [2/2] (short) (narrow) %v4169_v50, 16  ;;  %1169 = vxpose.xlu1.b32.start [1/2] (short) (narrow) %v936_v53, 16 }
 0x163   :  { %v4207_v54 = vpop.f32.mrb[32].mxu0 }
 0x164   :  { %v1524_v55 = vpop.f32.mrb[33].mxu0 }
 0x165   :  { %1170 = vxpose.xlu1.b32.end [2/2] (short) (narrow) %v4172_v52, 16  ;;  %1603 = vxpose.xlu0.b32.start [1/2] (short) (narrow) %v1524_v55, 16 }
 0x167   :  { %v4210_v56 = vpop.f32.mrb[34].mxu0 }
 0x168   :  { %v1534_v57 = vpop.f32.mrb[35].mxu0 }
 0x169   :  { %1604 = vxpose.xlu0.b32.end [2/2] (short) (narrow) %v4207_v54, 16  ;;  %1635 = vxpose.xlu1.b32.start [1/2] (short) (narrow) %v1534_v57, 16 }
 0x16b   :  { %v4213_v58 = vpop.f32.mrb[36].mxu0 }
 0x16c   :  { %v1544_v59 = vpop.f32.mrb[37].mxu0 }
 0x16d   :  { %1636 = vxpose.xlu1.b32.end [2/2] (short) (narrow) %v4210_v56, 16  ;;  %1667 = vxpose.xlu0.b32.start [1/2] (short) (narrow) %v1544_v59, 16 }
 0x16f   :  { %v4216_v60 = vpop.f32.mrb[38].mxu0 }
 0x170   :  { %v1554_v61 = vpop.f32.mrb[39].mxu0 }
 0x171   :  { %1668 = vxpose.xlu0.b32.end [2/2] (short) (narrow) %v4213_v58, 16  ;;  %1699 = vxpose.xlu1.b32.start [1/2] (short) (narrow) %v1554_v61, 16 }
 0x173   :  { %v4219_v62 = vpop.f32.mrb[40].mxu0 }
 0x174   :  { %v1564_v63 = vpop.f32.mrb[41].mxu0 }
 0x175   :  { %1700 = vxpose.xlu1.b32.end [2/2] (short) (narrow) %v4216_v60, 16  ;;  %1731 = vxpose.xlu0.b32.start [1/2] (short) (narrow) %v1564_v63, 16 }
 0x177   :  { %v4222_v0 = vpop.f32.mrb[42].mxu0 }
 0x178   :  { %v1574_v1 = vpop.f32.mrb[43].mxu0 }
 0x179   :  { %1732 = vxpose.xlu0.b32.end [2/2] (short) (narrow) %v4219_v62, 16  ;;  %1763 = vxpose.xlu1.b32.start [1/2] (short) (narrow) %v1574_v1, 16 }
 0x17b   :  { %v4225_v2 = vpop.f32.mrb[44].mxu0 }
 0x17c   :  { %v1584_v4 = vpop.f32.mrb[45].mxu0 }
 0x17d   :  { %1764 = vxpose.xlu1.b32.end [2/2] (short) (narrow) %v4222_v0, 16  ;;  %1795 = vxpose.xlu0.b32.start [1/2] (short) (narrow) %v1584_v4, 16 }
 0x17f   :  { %v4228_v7 = vpop.f32.mrb[46].mxu0 }
 0x180   :  { %v1594_v8 = vpop.f32.mrb[47].mxu0 }
 0x181   :  { %1796 = vxpose.xlu0.b32.end [2/2] (short) (narrow) %v4225_v2, 16  ;;  %1827 = vxpose.xlu1.b32.start [1/2] (short) (narrow) %v1594_v8, 16 }
 0x183   :  { %v4263_v9 = vpop.f32.mrb[48].mxu0 }
 0x184   :  { %v2182_v10 = vpop.f32.mrb[49].mxu0 }
 0x185   :  { %1828 = vxpose.xlu1.b32.end [2/2] (short) (narrow) %v4228_v7, 16  ;;  %2261 = vxpose.xlu0.b32.start [1/2] (short) (narrow) %v2182_v10, 16 }
 0x187   :  { %v4266_v5 = vpop.f32.mrb[50].mxu0 }
 0x188   :  { %v2192_v11 = vpop.f32.mrb[51].mxu0 }
 0x189   :  { %2262 = vxpose.xlu0.b32.end [2/2] (short) (narrow) %v4263_v9, 16  ;;  %2293 = vxpose.xlu1.b32.start [1/2] (short) (narrow) %v2192_v11, 16 }
 0x18b   :  { %v4269_v12 = vpop.f32.mrb[52].mxu0 }
 0x18c   :  { %v2202_v3 = vpop.f32.mrb[53].mxu0 }
 0x18d   :  { %2294 = vxpose.xlu1.b32.end [2/2] (short) (narrow) %v4266_v5, 16  ;;  %2325 = vxpose.xlu0.b32.start [1/2] (short) (narrow) %v2202_v3, 16 }
 0x18f   :  { %v4272_v13 = vpop.f32.mrb[54].mxu0 }
 0x190   :  { %v2212_v15 = vpop.f32.mrb[55].mxu0 }
 0x191   :  { %2326 = vxpose.xlu0.b32.end [2/2] (short) (narrow) %v4269_v12, 16  ;;  %2357 = vxpose.xlu1.b32.start [1/2] (short) (narrow) %v2212_v15, 16 }
 0x193   :  { %v4275_v16 = vpop.f32.mrb[56].mxu0 }
 0x194   :  { %v2222_v17 = vpop.f32.mrb[57].mxu0 }
 0x195   :  { %2358 = vxpose.xlu1.b32.end [2/2] (short) (narrow) %v4272_v13, 16  ;;  %2389 = vxpose.xlu0.b32.start [1/2] (short) (narrow) %v2222_v17, 16 }
 0x197   :  { %v4278_v18 = vpop.f32.mrb[58].mxu0 }
 0x198   :  { %v2232_v21 = vpop.f32.mrb[59].mxu0 }
 0x199   :  { %2390 = vxpose.xlu0.b32.end [2/2] (short) (narrow) %v4275_v16, 16  ;;  %2421 = vxpose.xlu1.b32.start [1/2] (short) (narrow) %v2232_v21, 16 }
 0x19b   :  { %v4281_v22 = vpop.f32.mrb[60].mxu0 }
 0x19c   :  { %v2242_v6 = vpop.f32.mrb[61].mxu0 }
 0x19d   :  { %2422 = vxpose.xlu1.b32.end [2/2] (short) (narrow) %v4278_v18, 16  ;;  %2453 = vxpose.xlu0.b32.start [1/2] (short) (narrow) %v2242_v6, 16 }
 0x19f   :  { %v4284_v14 = vpop.f32.mrb[62].mxu0 }
 0x1a0   :  { %v2252_v19 = vpop.f32.mrb[63].mxu0 }
 0x1a1   :  { %2454 = vxpose.xlu0.b32.end [2/2] (short) (narrow) %v4281_v22, 16  ;;  %2485 = vxpose.xlu1.b32.start [1/2] (short) (narrow) %v2252_v19, 16 }
 0x1a3   :  { %v4319_v20 = vpop.f32.mrb[64].mxu0 }
 0x1a4   :  { %v2840_v24 = vpop.f32.mrb[65].mxu0 }
 0x1a5   :  { %v319_v25 = vpop.trf.xlu0  ;;  %2486 = vxpose.xlu1.b32.end [2/2] (short) (narrow) %v4284_v14, 16  ;;  %2919 = vxpose.xlu0.b32.start [1/2] (short) (narrow) %v2840_v24, 16 }
 0x1a6   :  { %4121 = vmatprep.mubr.msk.f32.mxu1 %vm109_vm0, %v319_v25 }
 0x1a7   :  { %v4322_v26 = vpop.f32.mrb[66].mxu0 }
 0x1a8   :  { %v2850_v27 = vpop.f32.mrb[67].mxu0 }
 0x1a9   :  { %v320_v28 = vpop.trf.xlu0  ;;  %v351_v29 = vpop.trf.xlu1  ;;  %2920 = vxpose.xlu0.b32.end [2/2] (short) (narrow) %v4319_v20, 16  ;;  %2951 = vxpose.xlu1.b32.start [1/2] (short) (narrow) %v2850_v27, 16 }
 0x1aa   :  { %4122 = vmatmul.mubr.msk.f32.vlgmr.msra.gmra.mrb[0].mxu1 %vm109_vm0, %v320_v28 }
 0x1ab   :  { %4124 = vmatprep.mubr.msk.f32.mxu1 %vm109_vm0, %v351_v29  ;;  %4384 = vmatpush3.bf16.msra.mxu1 %v5007_v23  ;;  %v4325_v30 = vpop.f32.mrb[68].mxu0 }
 0x1ac   :  { %v2860_v31 = vpop.f32.mrb[69].mxu0  ;;  %4390 = vmatprep.subr.bf16.mxu1 %v5007_v23 }
 0x1ad   :  { %v352_v32 = vpop.trf.xlu1  ;;  %v383_v33 = vpop.trf.xlu0  ;;  %2952 = vxpose.xlu1.b32.end [2/2] (short) (narrow) %v4322_v26, 16  ;;  %2983 = vxpose.xlu0.b32.start [1/2] (short) (narrow) %v2860_v31, 16 }
 0x1ae   :  { %4125 = vmatmul.mubr.msk.f32.gmra.mrb[2].mxu1 %vm109_vm0, %v352_v32 }
 0x1af   :  { %4127 = vmatprep.mubr.msk.f32.mxu1 %vm109_vm0, %v383_v33  ;;  %v4328_v34 = vpop.f32.mrb[70].mxu0 }
 0x1b0   :  { %v2870_v35 = vpop.f32.mrb[71].mxu0 }
 0x1b1   :  { %v384_v36 = vpop.trf.xlu0  ;;  %v415_v37 = vpop.trf.xlu1  ;;  %2984 = vxpose.xlu0.b32.end [2/2] (short) (narrow) %v4325_v30, 16  ;;  %3015 = vxpose.xlu1.b32.start [1/2] (short) (narrow) %v2870_v35, 16 }
 0x1b2   :  { %4128 = vmatmul.mubr.msk.f32.gmra.mrb[4].mxu1 %vm109_vm0, %v384_v36 }
 0x1b3   :  { %4130 = vmatprep.mubr.msk.f32.mxu1 %vm109_vm0, %v415_v37  ;;  %v4331_v38 = vpop.f32.mrb[72].mxu0 }
 0x1b4   :  { %v2880_v39 = vpop.f32.mrb[73].mxu0 }
 0x1b5   :  { %v416_v40 = vpop.trf.xlu1  ;;  %v447_v41 = vpop.trf.xlu0  ;;  %3016 = vxpose.xlu1.b32.end [2/2] (short) (narrow) %v4328_v34, 16  ;;  %3047 = vxpose.xlu0.b32.start [1/2] (short) (narrow) %v2880_v39, 16 }
 0x1b6   :  { %4131 = vmatmul.mubr.msk.f32.gmra.mrb[6].mxu1 %vm109_vm0, %v416_v40 }
 0x1b7   :  { %4133 = vmatprep.mubr.msk.f32.mxu1 %vm109_vm0, %v447_v41  ;;  %v4334_v42 = vpop.f32.mrb[74].mxu0 }
 0x1b8   :  { %v2890_v43 = vpop.f32.mrb[75].mxu0 }
 0x1b9   :  { %v448_v44 = vpop.trf.xlu0  ;;  %v479_v45 = vpop.trf.xlu1  ;;  %3048 = vxpose.xlu0.b32.end [2/2] (short) (narrow) %v4331_v38, 16  ;;  %3079 = vxpose.xlu1.b32.start [1/2] (short) (narrow) %v2890_v43, 16 }
 0x1ba   :  { %4134 = vmatmul.mubr.msk.f32.gmra.mrb[8].mxu1 %vm109_vm0, %v448_v44 }
 0x1bb   :  { %4136 = vmatprep.mubr.msk.f32.mxu1 %vm109_vm0, %v479_v45  ;;  %v4337_v46 = vpop.f32.mrb[76].mxu0 }
 0x1bc   :  { %v2900_v47 = vpop.f32.mrb[77].mxu0 }
 0x1bd   :  { %v480_v48 = vpop.trf.xlu1  ;;  %v511_v49 = vpop.trf.xlu0  ;;  %3080 = vxpose.xlu1.b32.end [2/2] (short) (narrow) %v4334_v42, 16  ;;  %3111 = vxpose.xlu0.b32.start [1/2] (short) (narrow) %v2900_v47, 16 }
 0x1be   :  { %4137 = vmatmul.mubr.msk.f32.gmra.mrb[10].mxu1 %vm109_vm0, %v480_v48 }
 0x1bf   :  { %4139 = vmatprep.mubr.msk.f32.mxu1 %vm109_vm0, %v511_v49  ;;  %v4340_v50 = vpop.f32.mrb[78].mxu0 }
 0x1c0   :  { %v2910_v51 = vpop.f32.mrb[79].mxu0 }
 0x1c1   :  { %v512_v52 = vpop.trf.xlu0  ;;  %v543_v53 = vpop.trf.xlu1  ;;  %3112 = vxpose.xlu0.b32.end [2/2] (short) (narrow) %v4337_v46, 16  ;;  %3143 = vxpose.xlu1.b32.start [1/2] (short) (narrow) %v2910_v51, 16 }
 0x1c2   :  { %4140 = vmatmul.mubr.msk.f32.gmra.mrb[12].mxu1 %vm109_vm0, %v512_v52 }
 0x1c3   :  { %4142 = vmatprep.mubr.msk.f32.mxu1 %vm109_vm0, %v543_v53 }
 0x1c5   :  { %v544_v54 = vpop.trf.xlu1  ;;  %v961_v55 = vpop.trf.xlu0  ;;  %3144 = vxpose.xlu1.b32.end [2/2] (short) (narrow) %v4340_v50, 16 }
 0x1c6   :  { %4143 = vmatmul.mubr.msk.f32.gmra.mrb[14].mxu1 %vm109_vm0, %v544_v54 }
 0x1c7   :  { %4177 = vmatprep.mubr.msk.f32.mxu1 %vm109_vm0, %v961_v55 }
 0x1c9   :  { %v962_v56 = vpop.trf.xlu0  ;;  %v993_v57 = vpop.trf.xlu1 }
 0x1ca   :  { %4178 = vmatmul.mubr.msk.f32.vlgmr.msra.gmra.mrb[16].mxu1 %vm109_vm0, %v962_v56 }
 0x1cb   :  { %4180 = vmatprep.mubr.msk.f32.mxu1 %vm109_vm0, %v993_v57  ;;  %4392 = vmatpush3.bf16.msra.mxu1 %v5007_v23 }
 0x1cc   :  { %4398 = vmatprep.subr.bf16.mxu1 %v5007_v23 }
 0x1cd   :  { %v994_v58 = vpop.trf.xlu1  ;;  %v1025_v59 = vpop.trf.xlu0 }
 0x1ce   :  { %4181 = vmatmul.mubr.msk.f32.gmra.mrb[18].mxu1 %vm109_vm0, %v994_v58 }
 0x1cf   :  { %4183 = vmatprep.mubr.msk.f32.mxu1 %vm109_vm0, %v1025_v59 }
 0x1d1   :  { %v1026_v60 = vpop.trf.xlu0  ;;  %v1057_v61 = vpop.trf.xlu1 }
 0x1d2   :  { %4184 = vmatmul.mubr.msk.f32.gmra.mrb[20].mxu1 %vm109_vm0, %v1026_v60 }
 0x1d3   :  { %4186 = vmatprep.mubr.msk.f32.mxu1 %vm109_vm0, %v1057_v61 }
 0x1d5   :  { %v1058_v62 = vpop.trf.xlu1  ;;  %v1089_v63 = vpop.trf.xlu0 }
 0x1d6   :  { %4187 = vmatmul.mubr.msk.f32.gmra.mrb[22].mxu1 %vm109_vm0, %v1058_v62 }
 0x1d7   :  { %4189 = vmatprep.mubr.msk.f32.mxu1 %vm109_vm0, %v1089_v63 }
 0x1d9   :  { %v1090_v0 = vpop.trf.xlu0  ;;  %v1121_v1 = vpop.trf.xlu1 }
 0x1da   :  { %4190 = vmatmul.mubr.msk.f32.gmra.mrb[24].mxu1 %vm109_vm0, %v1090_v0 }
 0x1db   :  { %4192 = vmatprep.mubr.msk.f32.mxu1 %vm109_vm0, %v1121_v1 }
 0x1dd   :  { %v1122_v2 = vpop.trf.xlu1  ;;  %v1153_v4 = vpop.trf.xlu0 }
 0x1de   :  { %4193 = vmatmul.mubr.msk.f32.gmra.mrb[26].mxu1 %vm109_vm0, %v1122_v2 }
 0x1df   :  { %4195 = vmatprep.mubr.msk.f32.mxu1 %vm109_vm0, %v1153_v4 }
 0x1e1   :  { %v1154_v7 = vpop.trf.xlu0  ;;  %v1185_v8 = vpop.trf.xlu1 }
 0x1e2   :  { %4196 = vmatmul.mubr.msk.f32.gmra.mrb[28].mxu1 %vm109_vm0, %v1154_v7 }
 0x1e3   :  { %4198 = vmatprep.mubr.msk.f32.mxu1 %vm109_vm0, %v1185_v8 }
 0x1e5   :  { %v1186_v9 = vpop.trf.xlu1  ;;  %v1619_v10 = vpop.trf.xlu0 }
 0x1e6   :  { %4199 = vmatmul.mubr.msk.f32.gmra.mrb[30].mxu1 %vm109_vm0, %v1186_v9 }
 0x1e7   :  { %4233 = vmatprep.mubr.msk.f32.mxu1 %vm109_vm0, %v1619_v10 }
 0x1e9   :  { %v1620_v5 = vpop.trf.xlu0  ;;  %v1651_v11 = vpop.trf.xlu1 }
 0x1ea   :  { %4234 = vmatmul.mubr.msk.f32.vlgmr.msra.gmra.mrb[32].mxu1 %vm109_vm0, %v1620_v5 }
 0x1eb   :  { %4236 = vmatprep.mubr.msk.f32.mxu1 %vm109_vm0, %v1651_v11  ;;  %4400 = vmatpush3.bf16.msra.mxu1 %v5007_v23 }
 0x1ec   :  { %4406 = vmatprep.subr.bf16.mxu1 %v5007_v23 }
 0x1ed   :  { %v1652_v12 = vpop.trf.xlu1  ;;  %v1683_v3 = vpop.trf.xlu0 }
 0x1ee   :  { %4237 = vmatmul.mubr.msk.f32.gmra.mrb[34].mxu1 %vm109_vm0, %v1652_v12 }
 0x1ef   :  { %4239 = vmatprep.mubr.msk.f32.mxu1 %vm109_vm0, %v1683_v3 }
 0x1f1   :  { %v1684_v13 = vpop.trf.xlu0  ;;  %v1715_v15 = vpop.trf.xlu1 }
 0x1f2   :  { %4240 = vmatmul.mubr.msk.f32.gmra.mrb[36].mxu1 %vm109_vm0, %v1684_v13 }
 0x1f3   :  { %4242 = vmatprep.mubr.msk.f32.mxu1 %vm109_vm0, %v1715_v15 }
 0x1f5   :  { %v1716_v16 = vpop.trf.xlu1  ;;  %v1747_v17 = vpop.trf.xlu0 }
 0x1f6   :  { %4243 = vmatmul.mubr.msk.f32.gmra.mrb[38].mxu1 %vm109_vm0, %v1716_v16 }
 0x1f7   :  { %4245 = vmatprep.mubr.msk.f32.mxu1 %vm109_vm0, %v1747_v17 }
 0x1f9   :  { %v1748_v18 = vpop.trf.xlu0  ;;  %v1779_v21 = vpop.trf.xlu1 }
 0x1fa   :  { %4246 = vmatmul.mubr.msk.f32.gmra.mrb[40].mxu1 %vm109_vm0, %v1748_v18 }
 0x1fb   :  { %4248 = vmatprep.mubr.msk.f32.mxu1 %vm109_vm0, %v1779_v21 }
 0x1fd   :  { %v1780_v22 = vpop.trf.xlu1  ;;  %v1811_v6 = vpop.trf.xlu0 }
 0x1fe   :  { %4249 = vmatmul.mubr.msk.f32.gmra.mrb[42].mxu1 %vm109_vm0, %v1780_v22 }
 0x1ff   :  { %4251 = vmatprep.mubr.msk.f32.mxu1 %vm109_vm0, %v1811_v6 }
 0x201   :  { %v1812_v14 = vpop.trf.xlu0  ;;  %v1843_v19 = vpop.trf.xlu1 }
 0x202   :  { %4252 = vmatmul.mubr.msk.f32.gmra.mrb[44].mxu1 %vm109_vm0, %v1812_v14 }
 0x203   :  { %4254 = vmatprep.mubr.msk.f32.mxu1 %vm109_vm0, %v1843_v19 }
 0x205   :  { %v1844_v20 = vpop.trf.xlu1  ;;  %v2277_v24 = vpop.trf.xlu0 }
 0x206   :  { %4255 = vmatmul.mubr.msk.f32.gmra.mrb[46].mxu1 %vm109_vm0, %v1844_v20 }
 0x207   :  { %4289 = vmatprep.mubr.msk.f32.mxu1 %vm109_vm0, %v2277_v24 }
 0x209   :  { %v2278_v25 = vpop.trf.xlu0  ;;  %v2309_v26 = vpop.trf.xlu1 }
 0x20a   :  { %4290 = vmatmul.mubr.msk.f32.vlgmr.msra.gmra.mrb[48].mxu1 %vm109_vm0, %v2278_v25 }
 0x20b   :  { %4292 = vmatprep.mubr.msk.f32.mxu1 %vm109_vm0, %v2309_v26  ;;  %4408 = vmatpush3.bf16.msra.mxu1 %v5007_v23 }
 0x20d   :  { %v2310_v27 = vpop.trf.xlu1  ;;  %v2341_v28 = vpop.trf.xlu0 }
 0x20e   :  { %4293 = vmatmul.mubr.msk.f32.gmra.mrb[50].mxu1 %vm109_vm0, %v2310_v27 }
 0x20f   :  { %4295 = vmatprep.mubr.msk.f32.mxu1 %vm109_vm0, %v2341_v28 }
 0x211   :  { %v2342_v29 = vpop.trf.xlu0  ;;  %v2373_v30 = vpop.trf.xlu1 }
 0x212   :  { %4296 = vmatmul.mubr.msk.f32.gmra.mrb[52].mxu1 %vm109_vm0, %v2342_v29 }
 0x213   :  { %4298 = vmatprep.mubr.msk.f32.mxu1 %vm109_vm0, %v2373_v30 }
 0x215   :  { %v2374_v31 = vpop.trf.xlu1  ;;  %v2405_v32 = vpop.trf.xlu0 }
 0x216   :  { %4299 = vmatmul.mubr.msk.f32.gmra.mrb[54].mxu1 %vm109_vm0, %v2374_v31 }
 0x217   :  { %4301 = vmatprep.mubr.msk.f32.mxu1 %vm109_vm0, %v2405_v32 }
 0x219   :  { %v2406_v33 = vpop.trf.xlu0  ;;  %v2437_v23 = vpop.trf.xlu1 }
 0x21a   :  { %4302 = vmatmul.mubr.msk.f32.gmra.mrb[56].mxu1 %vm109_vm0, %v2406_v33 }
 0x21b   :  { %4304 = vmatprep.mubr.msk.f32.mxu1 %vm109_vm0, %v2437_v23 }
 0x21d   :  { %v2438_v34 = vpop.trf.xlu1  ;;  %v2469_v35 = vpop.trf.xlu0 }
 0x21e   :  { %4305 = vmatmul.mubr.msk.f32.gmra.mrb[58].mxu1 %vm109_vm0, %v2438_v34 }
 0x21f   :  { %4307 = vmatprep.mubr.msk.f32.mxu1 %vm109_vm0, %v2469_v35 }
 0x221   :  { %v2470_v36 = vpop.trf.xlu0  ;;  %v2501_v37 = vpop.trf.xlu1 }
 0x222   :  { %4308 = vmatmul.mubr.msk.f32.gmra.mrb[60].mxu1 %vm109_vm0, %v2470_v36 }
 0x223   :  { %4310 = vmatprep.mubr.msk.f32.mxu1 %vm109_vm0, %v2501_v37 }
 0x225   :  { %v2502_v38 = vpop.trf.xlu1  ;;  %v2935_v39 = vpop.trf.xlu0 }
 0x226   :  { %4311 = vmatmul.mubr.msk.f32.gmra.mrb[62].mxu1 %vm109_vm0, %v2502_v38 }
 0x227   :  { %4345 = vmatprep.mubr.msk.f32.mxu1 %vm109_vm0, %v2935_v39 }
 0x229   :  { %v2936_v40 = vpop.trf.xlu0  ;;  %v2967_v41 = vpop.trf.xlu1 }
 0x22a   :  { %4346 = vmatmul.mubr.msk.f32.vlgmr.msra.gmra.mrb[64].mxu1 %vm109_vm0, %v2936_v40 }
 0x22b   :  { %4348 = vmatprep.mubr.msk.f32.mxu1 %vm109_vm0, %v2967_v41 }
 0x22d   :  { %v2968_v42 = vpop.trf.xlu1  ;;  %v2999_v43 = vpop.trf.xlu0 }
 0x22e   :  { %4349 = vmatmul.mubr.msk.f32.gmra.mrb[66].mxu1 %vm109_vm0, %v2968_v42 }
 0x22f   :  { %4351 = vmatprep.mubr.msk.f32.mxu1 %vm109_vm0, %v2999_v43 }
 0x231   :  { %v3000_v44 = vpop.trf.xlu0  ;;  %v3031_v45 = vpop.trf.xlu1 }
 0x232   :  { %4352 = vmatmul.mubr.msk.f32.gmra.mrb[68].mxu1 %vm109_vm0, %v3000_v44 }
 0x233   :  { %4354 = vmatprep.mubr.msk.f32.mxu1 %vm109_vm0, %v3031_v45 }
 0x235   :  { %v3032_v46 = vpop.trf.xlu1  ;;  %v3063_v47 = vpop.trf.xlu0 }
 0x236   :  { %4355 = vmatmul.mubr.msk.f32.gmra.mrb[70].mxu1 %vm109_vm0, %v3032_v46 }
 0x237   :  { %4357 = vmatprep.mubr.msk.f32.mxu1 %vm109_vm0, %v3063_v47 }
 0x239   :  { %v3064_v48 = vpop.trf.xlu0  ;;  %v3095_v49 = vpop.trf.xlu1 }
 0x23a   :  { %4358 = vmatmul.mubr.msk.f32.gmra.mrb[72].mxu1 %vm109_vm0, %v3064_v48 }
 0x23b   :  { %4360 = vmatprep.mubr.msk.f32.mxu1 %vm109_vm0, %v3095_v49 }
 0x23d   :  { %v3096_v50 = vpop.trf.xlu1  ;;  %v3127_v51 = vpop.trf.xlu0 }
 0x23e   :  { %4361 = vmatmul.mubr.msk.f32.gmra.mrb[74].mxu1 %vm109_vm0, %v3096_v50 }
 0x23f   :  { %4363 = vmatprep.mubr.msk.f32.mxu1 %vm109_vm0, %v3127_v51 }
 0x241   :  { %v3128_v52 = vpop.trf.xlu0  ;;  %v3159_v53 = vpop.trf.xlu1 }
 0x242   :  { %4364 = vmatmul.mubr.msk.f32.gmra.mrb[76].mxu1 %vm109_vm0, %v3128_v52 }
 0x243   :  { %4366 = vmatprep.mubr.msk.f32.mxu1 %vm109_vm0, %v3159_v53 }
 0x245   :  { %v3160_v54 = vpop.trf.xlu1 }
 0x246   :  { %4367 = vmatmul.mubr.msk.f32.gmra.mrb[78].mxu1 %vm109_vm0, %v3160_v54 }
 0x27d   :  { %v4123_v55 = vpop.f32.mrb[0].mxu1 }
 0x27e   :  { %v673_v56 = vpop.f32.mrb[1].mxu1  ;;  %v5107_v5 = vmul.f32 %v4123_v55, %v4123_v55 }
 0x27f   :  { %v5113_v13 = vmul.f32 %v673_v56, %v673_v56 }
 0x281   :  { %v4126_v57 = vpop.f32.mrb[2].mxu1 }
 0x282   :  { %v683_v58 = vpop.f32.mrb[3].mxu1  ;;  %v5127_v22 = vmul.f32 %v4126_v57, %v4126_v57 }
 0x283   :  { %v5133_v20 = vmul.f32 %v683_v58, %v683_v58 }
 0x285   :  { %v4129_v59 = vpop.f32.mrb[4].mxu1 }
 0x286   :  { %v693_v60 = vpop.f32.mrb[5].mxu1  ;;  %v5147_v29 = vmul.f32 %v4129_v59, %v4129_v59 }
 0x287   :  { %v5153_v33 = vmul.f32 %v693_v60, %v693_v60 }
 0x289   :  { %v4132_v61 = vpop.f32.mrb[6].mxu1 }
 0x28a   :  { %v703_v62 = vpop.f32.mrb[7].mxu1  ;;  %v5167_v38 = vmul.f32 %v4132_v61, %v4132_v61 }
 0x28b   :  { %v5173_v42 = vmul.f32 %v703_v62, %v703_v62 }
 0x28d   :  { %v4135_v63 = vpop.f32.mrb[8].mxu1 }
 0x28e   :  { %v713_v0 = vpop.f32.mrb[9].mxu1  ;;  %v5187_v48 = vmul.f32 %v4135_v63, %v4135_v63 }
 0x28f   :  { %v5193_v52 = vmul.f32 %v713_v0, %v713_v0 }
 0x291   :  { %v4138_v1 = vpop.f32.mrb[10].mxu1 }
 0x292   :  { %v723_v2 = vpop.f32.mrb[11].mxu1 }
 0x295   :  { %v5099_v4 = vpop.f32.mrb[12].mxu1 }
 0x296   :  { %v5101_v7 = vpop.f32.mrb[13].mxu1 }
 0x299   :  { %v5103_v8 = vpop.f32.mrb[14].mxu1 }
 0x29a   :  { %v5105_v9 = vpop.f32.mrb[15].mxu1 }
 0x29d   :  { %v4179_v10 = vpop.f32.mrb[16].mxu1 }
 0x29e   :  { %v5109_v11 = vmul.f32 %v4179_v10, %v4179_v10  ;;  %v5111_v12 = vmul.f32 %v4179_v10, %v4123_v55  ;;  %v1315_v3 = vpop.f32.mrb[17].mxu1 }
 0x29f   :  { %v5115_v15 = vmul.f32 %v1315_v3, %v1315_v3  ;;  %v5117_v16 = vmul.f32 %v1315_v3, %v673_v56 }
 0x2a0   :  { %5582 = vst [vmem:[#allocation15_spill] sm:$0xff] %v5111_v12  ;;  %v5121_v17 = vadd.f32 %v5109_v11, %v5107_v5 }
 0x2a1   :  { %5583 = vst [vmem:[#allocation16_spill] sm:$0xff] %v5117_v16  ;;  %v5125_v18 = vadd.f32 %v5115_v15, %v5113_v13  ;;  %v4182_v21 = vpop.f32.mrb[18].mxu1 }
 0x2a2   :  { %v5129_v6 = vmul.f32 %v4182_v21, %v4182_v21  ;;  %v5131_v14 = vmul.f32 %v4182_v21, %v4126_v57  ;;  %v1325_v19 = vpop.f32.mrb[19].mxu1 }
 0x2a3   :  { %v5135_v24 = vmul.f32 %v1325_v19, %v1325_v19  ;;  %v5137_v25 = vmul.f32 %v1325_v19, %v683_v58  ;;  %v5207_v58 = vmul.f32 %v4138_v1, %v4138_v1 }
 0x2a4   :  { %5584 = vst [vmem:[#allocation17_spill] sm:$0xff] %v5131_v14  ;;  %v5141_v26 = vadd.f32 %v5129_v6, %v5127_v22 }
 0x2a5   :  { %5585 = vst [vmem:[#allocation18_spill] sm:$0xff] %v5137_v25  ;;  %v5145_v27 = vadd.f32 %v5135_v24, %v5133_v20  ;;  %v4185_v28 = vpop.f32.mrb[20].mxu1  ;;  %5588 = vst [vmem:[#allocation21_spill] sm:$0xff] %v5207_v58 }
 0x2a6   :  { %v5149_v30 = vmul.f32 %v4185_v28, %v4185_v28  ;;  %v5151_v31 = vmul.f32 %v4185_v28, %v4129_v59  ;;  %v1335_v32 = vpop.f32.mrb[21].mxu1 }
 0x2a7   :  { %v5155_v23 = vmul.f32 %v1335_v32, %v1335_v32  ;;  %v5157_v34 = vmul.f32 %v1335_v32, %v693_v60  ;;  %v5238_v32 = vmul.f32 %v5101_v7, %v5101_v7 }
 0x2a8   :  { %5586 = vst [vmem:[#allocation19_spill] sm:$0xff] %v5151_v31  ;;  %v5161_v35 = vadd.f32 %v5149_v30, %v5147_v29 }
 0x2a9   :  { %5587 = vst [vmem:[#allocation20_spill] sm:$0xff] %v5157_v34  ;;  %v5165_v36 = vadd.f32 %v5155_v23, %v5153_v33  ;;  %v4188_v37 = vpop.f32.mrb[22].mxu1  ;;  %5597 = vst [vmem:[#allocation30_spill] sm:$0xff] %v5238_v32 }
 0x2aa   :  { %v5169_v39 = vmul.f32 %v4188_v37, %v4188_v37  ;;  %v5171_v40 = vmul.f32 %v4188_v37, %v4132_v61  ;;  %v1345_v41 = vpop.f32.mrb[23].mxu1 }
 0x2ab   :  { %v5175_v43 = vmul.f32 %v1345_v41, %v1345_v41  ;;  %v5177_v44 = vmul.f32 %v1345_v41, %v703_v62  ;;  %v5213_v62 = vmul.f32 %v723_v2, %v723_v2 }
 0x2ac   :  { %v5181_v45 = vadd.f32 %v5169_v39, %v5167_v38 }
 0x2ad   :  { %v5185_v46 = vadd.f32 %v5175_v43, %v5173_v42  ;;  %v4191_v47 = vpop.f32.mrb[24].mxu1  ;;  %5590 = vst [vmem:[#allocation23_spill] sm:$0xff] %v5213_v62 }
 0x2ae   :  { %v5189_v49 = vmul.f32 %v4191_v47, %v4191_v47  ;;  %v5191_v50 = vmul.f32 %v4191_v47, %v4135_v63  ;;  %v1355_v51 = vpop.f32.mrb[25].mxu1 }
 0x2af   :  { %v5195_v53 = vmul.f32 %v1355_v51, %v1355_v51  ;;  %v5197_v54 = vmul.f32 %v1355_v51, %v713_v0 }
 0x2b0   :  { %v5201_v55 = vadd.f32 %v5189_v49, %v5187_v48 }
 0x2b1   :  { %v5205_v56 = vadd.f32 %v5195_v53, %v5193_v52  ;;  %v4194_v57 = vpop.f32.mrb[26].mxu1 }
 0x2b2   :  { %v5209_v59 = vmul.f32 %v4194_v57, %v4194_v57  ;;  %v5211_v60 = vmul.f32 %v4194_v57, %v4138_v1  ;;  %v1365_v61 = vpop.f32.mrb[27].mxu1  ;;  %v5229_v1 = vmul.f32 %v5099_v4, %v5099_v4  ;;  %v5255_v57 = vmul.f32 %v5103_v8, %v5103_v8 }
 0x2b3   :  { %v5215_v63 = vmul.f32 %v1365_v61, %v1365_v61  ;;  %v5217_v0 = vmul.f32 %v1365_v61, %v723_v2 }
 0x2b4   :  { %5589 = vst [vmem:[#allocation22_spill] sm:$0xff] %v5211_v60  ;;  %v5221_v10 = vadd.f32 %v5209_v59, %v5207_v58  ;;  %5594 = vst [vmem:[#allocation27_spill] sm:$0xff] %v5229_v1 }
 0x2b5   :  { %5591 = vst [vmem:[#allocation24_spill] sm:$0xff] %v5217_v0  ;;  %v5225_v3 = vadd.f32 %v5215_v63, %v5213_v62  ;;  %v4197_v21 = vpop.f32.mrb[28].mxu1  ;;  %5602 = vst [vmem:[#allocation35_spill] sm:$0xff] %v5255_v57  ;;  %v3500_v62 = vmul.f32 2.0, %v5157_v34 }
 0x2b6   :  { %5592 = vst [vmem:[#allocation25_spill] sm:$0xff] %v5221_v10  ;;  %v5231_v19 = vmul.f32 %v4197_v21, %v4197_v21  ;;  %v5234_v28 = vmul.f32 %v4197_v21, %v5099_v4  ;;  %v1375_v2 = vpop.f32.mrb[29].mxu1  ;;  %v3497_v10 = vmul.f32 2.0, %v5111_v12  ;;  %v3501_v12 = vmul.f32 2.0, %v5151_v31 }
 0x2b7   :  { %5593 = vst [vmem:[#allocation26_spill] sm:$0xff] %v5225_v3  ;;  %v5240_v37 = vmul.f32 %v1375_v2, %v1375_v2  ;;  %v5243_v41 = vmul.f32 %v1375_v2, %v5101_v7  ;;  %v5264_v2 = vmul.f32 %v5105_v9, %v5105_v9 }
 0x2b8   :  { %5595 = vst [vmem:[#allocation28_spill] sm:$0xff] %v5231_v19  ;;  %5596 = vst [vmem:[#allocation29_spill] sm:$0xff] %v5234_v28  ;;  %v5247_v47 = vadd.f32 %v5231_v19, %v5229_v1  ;;  %v3498_v1 = vmul.f32 2.0, %v5137_v25 }
 0x2b9   :  { %5598 = vst [vmem:[#allocation31_spill] sm:$0xff] %v5240_v37  ;;  %5599 = vst [vmem:[#allocation32_spill] sm:$0xff] %v5243_v41  ;;  %v5251_v51 = vadd.f32 %v5240_v37, %v5238_v32  ;;  %v4200_v4 = vpop.f32.mrb[30].mxu1  ;;  %v3593_v32 = vadd.f32 0.0001, %v5121_v17 }
 0x2ba   :  { %5600 = vst [vmem:[#allocation33_spill] sm:$0xff] %v5247_v47  ;;  %v5257_v61 = vmul.f32 %v4200_v4, %v4200_v4  ;;  %v5260_v21 = vmul.f32 %v4200_v4, %v5103_v8  ;;  %v1385_v7 = vpop.f32.mrb[31].mxu1  ;;  %5605 = vst [vmem:[#allocation38_spill] sm:$0xff] %v5264_v2  ;;  %v5348_v17 = vadd.f32 0.0001, %v3498_v1  ;;  %v3503_v1 = vmul.f32 2.0, %v5171_v40 }
 0x2bb   :  { %5601 = vst [vmem:[#allocation34_spill] sm:$0xff] %v5251_v51  ;;  %v5266_v41 = vmul.f32 %v1385_v7, %v1385_v7  ;;  %v5269_v28 = vmul.f32 %v1385_v7, %v5105_v9 }
 0x2bc   :  { %5603 = vst [vmem:[#allocation36_spill] sm:$0xff] %v5257_v61  ;;  %5604 = vst [vmem:[#allocation37_spill] sm:$0xff] %v5260_v21  ;;  %v5273_v0 = vadd.f32 %v5257_v61, %v5255_v57 }
 0x2bd   :  { %5606 = vst [vmem:[#allocation39_spill] sm:$0xff] %v5266_v41  ;;  %5607 = vst [vmem:[#allocation40_spill] sm:$0xff] %v5269_v28  ;;  %v5277_v60 = vadd.f32 %v5266_v41, %v5264_v2  ;;  %v4235_v8 = vpop.f32.mrb[32].mxu1 }
 0x2be   :  { %5608 = vst [vmem:[#allocation41_spill] sm:$0xff] %v5273_v0  ;;  %v3417_v4 = vsub.f32 %v4235_v8, %v5107_v5  ;;  %v1973_v21 = vpop.f32.mrb[33].mxu1  ;;  %v5335_v8 = vadd.f32 0.0001, %v3497_v10  ;;  %v3595_v10 = vadd.f32 0.0001, %v5141_v26 }
 0x2bf   :  { %5609 = vst [vmem:[#allocation42_spill] sm:$0xff] %v5277_v60  ;;  %v3416_v51 = vsub.f32 %v1973_v21, %v5113_v13 }
 0x2c0   :  { %5613 = vst [vmem:[#allocation46_spill] sm:$0xff] %v5335_v8  ;;  %v3433_v8 = vmax.f32 %v3417_v4, 0.0 }
 0x2c1   :  { %v4238_v47 = vpop.f32.mrb[34].mxu1  ;;  %v3432_v31 = vmax.f32 %v3416_v51, 0.0 }
 0x2c2   :  { %v3419_v37 = vsub.f32 %v4238_v47, %v5127_v22  ;;  %v1983_v3 = vpop.f32.mrb[35].mxu1  ;;  %v3496_v22 = vmul.f32 2.0, %v5117_v16  ;;  %v3592_v16 = vadd.f32 0.0001, %v5125_v18 }
 0x2c3   :  { %v3418_v9 = vsub.f32 %v1983_v3, %v5133_v20  ;;  %v3499_v3 = vmul.f32 2.0, %v5131_v14 }
 0x2c4   :  { %v3435_v51 = vmax.f32 %v3419_v37, 0.0 }
 0x2c5   :  { %v5283_v7 = vpop.f32.mrb[36].mxu1  ;;  %v5345_v2 = vadd.f32 0.0001, %v3499_v3  ;;  %v3434_v3 = vmax.f32 %v3418_v9, 0.0 }
 0x2c6   :  { %v5287_v0 = vpop.f32.mrb[37].mxu1  ;;  %v5616_v37 = vsub.f32 %v5283_v7, %v5147_v29 }
 0x2c8   :  { %v3437_v9 = vmax.f32 %v5616_v37, 0.0 }
 0x2c9   :  { %v5291_v5 = vpop.f32.mrb[38].mxu1 }
 0x2ca   :  { %v5295_v21 = vpop.f32.mrb[39].mxu1 }
 0x2cd   :  { %v5299_v20 = vpop.f32.mrb[40].mxu1 }
 0x2ce   :  { %v5303_v47 = vpop.f32.mrb[41].mxu1 }
 0x2d1   :  { %v5307_v60 = vpop.f32.mrb[42].mxu1 }
 0x2d2   :  { %v5311_v28 = vpop.f32.mrb[43].mxu1 }
 0x2d5   :  { %v5315_v41 = vpop.f32.mrb[44].mxu1 }
 0x2d6   :  { %5610 = vst [vmem:[#allocation43_spill] sm:$0xff] %v5315_v41  ;;  %v5319_v61 = vpop.f32.mrb[45].mxu1 }
 0x2d9   :  { %v5323_v19 = vpop.f32.mrb[46].mxu1 }
 0x2da   :  { %5611 = vst [vmem:[#allocation44_spill] sm:$0xff] %v5323_v19  ;;  %v5328_v58 = vpop.f32.mrb[47].mxu1  ;;  %v5340_v19 = vadd.f32 0.0001, %v3496_v22  ;;  %v5351_v22 = vadd.f32 0.0001, %v3501_v12 }
 0x2db   :  { %5612 = vst [vmem:[#allocation45_spill] sm:$0xff] %v5328_v58 }
 0x2dc   :  { %5614 = vst [vmem:[#allocation47_spill] sm:$0xff] %v5340_v19  ;;  %5615 = vst [vmem:[#allocation48_spill] sm:$0xff] %v5351_v22 }
 0x2dd   :  { %v4291_v41 = vpop.f32.mrb[48].mxu1 }
 0x2de   :  { %v3449_v13 = vsub.f32 %v4291_v41, %v5109_v11  ;;  %v2631_v57 = vpop.f32.mrb[49].mxu1  ;;  %v3594_v41 = vadd.f32 0.0001, %v5145_v27 }
 0x2df   :  { %v3448_v14 = vsub.f32 %v2631_v57, %v5115_v15  ;;  %v3597_v15 = vadd.f32 0.0001, %v5161_v35  ;;  %v5355_v57 = vadd.f32 0.0001, %v3500_v62 }
 0x2e0   :  { %v3465_v25 = vmax.f32 %v3449_v13, 0.0 }
 0x2e1   :  { %v3464_v58 = vmax.f32 %v3448_v14, 0.0  ;;  %v4294_v11 = vpop.f32.mrb[50].mxu1 }
 0x2e2   :  { %v3609_v18 = vadd.f32 %v3465_v25, %v3433_v8  ;;  %v3451_v34 = vsub.f32 %v4294_v11, %v5129_v6  ;;  %v2641_v19 = vpop.f32.mrb[51].mxu1  ;;  %v3596_v25 = vadd.f32 0.0001, %v5165_v36  ;;  %v5617_v11 = vsub.f32 %v5287_v0, %v5153_v33 }
 0x2e3   :  { %v3608_v26 = vadd.f32 %v3464_v58, %v3432_v31  ;;  %v3450_v4 = vsub.f32 %v2641_v19, %v5135_v24  ;;  %v3502_v31 = vmul.f32 2.0, %v5177_v44  ;;  %v3505_v33 = vmul.f32 2.0, %v5191_v50 }
 0x2e4   :  { %v3625_v14 = vadd.f32 0.0009, %v3609_v18  ;;  %v3467_v13 = vmax.f32 %v3451_v34, 0.0  ;;  %v5367_v34 = vadd.f32 0.0001, %v3503_v1  ;;  %v5618_v0 = vsub.f32 %v5291_v5, %v5167_v38 }
 0x2e5   :  { %v3624_v27 = vadd.f32 0.0009, %v3608_v26  ;;  %v3466_v12 = vmax.f32 %v3450_v4, 0.0  ;;  %v4297_v22 = vpop.f32.mrb[52].mxu1  ;;  %v3504_v38 = vmul.f32 2.0, %v5197_v54 }
 0x2e6   :  { %v5360_v6 = vmul.f32 %v3625_v14, %v3593_v32  ;;  %v3611_v8 = vadd.f32 %v3467_v13, %v3435_v51  ;;  %v3453_v35 = vsub.f32 %v4297_v22, %v5149_v30  ;;  %v2651_v62 = vpop.f32.mrb[53].mxu1  ;;  %v3436_v30 = vmax.f32 %v5617_v11, 0.0 }
 0x2e7   :  { %v5364_v24 = vmul.f32 %v3624_v27, %v3592_v16  ;;  %v3610_v58 = vadd.f32 %v3466_v12, %v3434_v3  ;;  %v3452_v19 = vsub.f32 %v2651_v62, %v5155_v23  ;;  %v3599_v16 = vadd.f32 0.0001, %v5181_v45 }
 0x2e8   :  { %v3627_v36 = vadd.f32 0.0009, %v3611_v8  ;;  %v3469_v32 = vmax.f32 %v3453_v35, 0.0  ;;  %v5379_v14 = vadd.f32 0.0001, %v3502_v31  ;;  %v3439_v3 = vmax.f32 %v5618_v0, 0.0 }
 0x2e9   :  { %v3626_v22 = vadd.f32 0.0009, %v3610_v58  ;;  %v3468_v18 = vmax.f32 %v3452_v19, 0.0  ;;  %v4300_v26 = vpop.f32.mrb[54].mxu1  ;;  %v5619_v27 = vsub.f32 %v5295_v21, %v5173_v42  ;;  %v5399_v42 = vadd.f32 0.0001, %v3505_v33 }
 0x2ea   :  { %v5376_v4 = vmul.f32 %v3627_v36, %v3595_v10  ;;  %v3613_v23 = vadd.f32 %v3469_v32, %v3437_v9  ;;  %v3455_v1 = vsub.f32 %v4300_v26, %v5169_v39  ;;  %v2661_v51 = vpop.f32.mrb[55].mxu1  ;;  %v5620_v21 = vsub.f32 %v5299_v20, %v5187_v48 }
 0x2eb   :  { %v5381_v29 = vmul.f32 %v3626_v22, %v3594_v41  ;;  %v3612_v7 = vadd.f32 %v3468_v18, %v3436_v30  ;;  %v3454_v13 = vsub.f32 %v2661_v51, %v5175_v43  ;;  %v3438_v39 = vmax.f32 %v5619_v27, 0.0 }
 0x2ec   :  { %v3629_v45 = vadd.f32 0.0009, %v3613_v23  ;;  %v3471_v10 = vmax.f32 %v3455_v1, 0.0  ;;  %v3598_v41 = vadd.f32 0.0001, %v5185_v46  ;;  %v3441_v9 = vmax.f32 %v5620_v21, 0.0 }
 0x2ed   :  { %v3628_v12 = vadd.f32 0.0009, %v3612_v7  ;;  %v3470_v8 = vmax.f32 %v3454_v13, 0.0  ;;  %v4303_v35 = vpop.f32.mrb[56].mxu1  ;;  %v5621_v36 = vsub.f32 %v5303_v47, %v5193_v52  ;;  %v5411_v23 = vadd.f32 0.0001, %v3504_v38 }
 0x2ee   :  { %v5392_v62 = vmul.f32 %v3629_v45, %v3597_v15  ;;  %v3615_v43 = vadd.f32 %v3471_v10, %v3439_v3  ;;  %v3457_v31 = vsub.f32 %v4303_v35, %v5189_v49  ;;  %v2671_v58 = vpop.f32.mrb[57].mxu1  ;;  %v3600_v52 = vadd.f32 0.0001, %v5205_v56  ;;  %v5622_v47 = vld [vmem:[#allocation21_spill] sm:$0xff]  ;;  %v5624_v13 = vld [vmem:[#allocation23_spill] sm:$0xff]  ;;  %v5628_v35 = vld [vmem:[#allocation26_spill] sm:$0xff] }
 0x2ef   :  { %v5396_v5 = vmul.f32 %v3628_v12, %v3596_v25  ;;  %v3614_v19 = vadd.f32 %v3470_v8, %v3438_v39  ;;  %v3456_v37 = vsub.f32 %v2671_v58, %v5195_v53  ;;  %v3440_v49 = vmax.f32 %v5621_v36, 0.0  ;;  %v5626_v10 = vld [vmem:[#allocation25_spill] sm:$0xff]  ;;  %v5627_v12 = vld [vmem:[#allocation28_spill] sm:$0xff]  ;;  %v5634_v36 = vld [vmem:[#allocation30_spill] sm:$0xff] }
 0x2f0   :  { %v3631_v46 = vadd.f32 0.0009, %v3615_v43  ;;  %v3473_v15 = vmax.f32 %v3457_v31, 0.0  ;;  %v3601_v25 = vadd.f32 0.0001, %v5201_v55  ;;  %v5623_v51 = vsub.f32 %v5307_v60, %v5622_v47  ;;  %v5629_v31 = vld [vmem:[#allocation31_spill] sm:$0xff] }
 0x2f1   :  { %v3630_v32 = vadd.f32 0.0009, %v3614_v19  ;;  %v3472_v11 = vmax.f32 %v3456_v37, 0.0  ;;  %v4306_v30 = vpop.f32.mrb[58].mxu1  ;;  %v5625_v33 = vsub.f32 %v5311_v28, %v5624_v13  ;;  %v3603_v27 = vadd.f32 0.0001, %v5626_v10 }
 0x2f2   :  { %v5408_v22 = vmul.f32 %v3631_v46, %v3599_v16  ;;  %v3617_v53 = vadd.f32 %v3473_v15, %v3441_v9  ;;  %v3459_v18 = vsub.f32 %v4306_v30, %v5209_v59  ;;  %v2681_v26 = vpop.f32.mrb[59].mxu1  ;;  %v3443_v7 = vmax.f32 %v5623_v51, 0.0  ;;  %v5630_v28 = vld [vmem:[#allocation33_spill] sm:$0xff]  ;;  %v5631_v19 = vld [vmem:[#allocation43_spill] sm:$0xff] }
 0x2f3   :  { %v5413_v48 = vmul.f32 %v3630_v32, %v3598_v41  ;;  %v3616_v20 = vadd.f32 %v3472_v11, %v3440_v49  ;;  %v3458_v1 = vsub.f32 %v2681_v26, %v5215_v63  ;;  %v3442_v59 = vmax.f32 %v5625_v33, 0.0  ;;  %v5632_v37 = vld [vmem:[#allocation27_spill] sm:$0xff] }
 0x2f4   :  { %v3633_v55 = vadd.f32 0.0009, %v3617_v53  ;;  %v3475_v16 = vmax.f32 %v3459_v18, 0.0  ;;  %v3602_v60 = vadd.f32 0.0001, %v5628_v35  ;;  %v5633_v21 = vsub.f32 %v5631_v19, %v5632_v37  ;;  %v5636_v53 = vld [vmem:[#allocation34_spill] sm:$0xff] }
 0x2f5   :  { %v3632_v0 = vadd.f32 0.0009, %v3616_v20  ;;  %v3474_v3 = vmax.f32 %v3458_v1, 0.0  ;;  %v4309_v45 = vpop.f32.mrb[60].mxu1  ;;  %v3605_v38 = vadd.f32 0.0001, %v5630_v28  ;;  %v5635_v49 = vsub.f32 %v5319_v61, %v5634_v36 }
 0x2f6   :  { %v5424_v39 = vmul.f32 %v3633_v55, %v3601_v25  ;;  %v3619_v63 = vadd.f32 %v3475_v16, %v3443_v7  ;;  %v3461_v56 = vsub.f32 %v4309_v45, %v5627_v12  ;;  %v2691_v8 = vpop.f32.mrb[61].mxu1  ;;  %v3445_v9 = vmax.f32 %v5633_v21, 0.0  ;;  %v5637_v1 = vld [vmem:[#allocation36_spill] sm:$0xff]  ;;  %v5638_v55 = vld [vmem:[#allocation39_spill] sm:$0xff]  ;;  %v5642_v45 = vld [vmem:[#allocation22_spill] sm:$0xff] }
 0x2f7   :  { %v5428_v41 = vmul.f32 %v3632_v0, %v3600_v52  ;;  %v3618_v43 = vadd.f32 %v3474_v3, %v3442_v59  ;;  %v3460_v58 = vsub.f32 %v2691_v8, %v5629_v31  ;;  %v3444_v32 = vmax.f32 %v5635_v49, 0.0  ;;  %v5639_v61 = vld [vmem:[#allocation44_spill] sm:$0xff]  ;;  %v5640_v13 = vld [vmem:[#allocation35_spill] sm:$0xff] }
 0x2f8   :  { %v3635_v46 = vadd.f32 0.0009, %v3619_v63  ;;  %v3477_v15 = vmax.f32 %v3461_v56, 0.0  ;;  %v3604_v18 = vadd.f32 0.0001, %v5636_v53  ;;  %4419 = vrcp.f32 %v5360_v6  ;;  %v5644_v63 = vld [vmem:[#allocation38_spill] sm:$0xff] }
 0x2f9   :  { %v3634_v11 = vadd.f32 0.0009, %v3618_v43  ;;  %v3476_v30 = vmax.f32 %v3460_v58, 0.0  ;;  %v4312_v25 = vpop.f32.mrb[62].mxu1  ;;  %v5641_v33 = vsub.f32 %v5639_v61, %v5640_v13  ;;  %4421 = vrcp.f32 %v5364_v24  ;;  %v5647_v28 = vld [vmem:[#allocation15_spill] sm:$0xff] }
 0x2fa   :  { %v5439_v26 = vmul.f32 %v3635_v46, %v3603_v27  ;;  %v3621_v20 = vadd.f32 %v3477_v15, %v3445_v9  ;;  %v3463_v52 = vsub.f32 %v4312_v25, %v5637_v1  ;;  %v2701_v47 = vpop.f32.mrb[63].mxu1  ;;  %v3507_v10 = vmul.f32 2.0, %v5642_v45  ;;  %v5643_v27 = vld [vmem:[#allocation45_spill] sm:$0xff]  ;;  %v5648_v9 = vld [vmem:[#allocation16_spill] sm:$0xff] }
 0x2fb   :  { %v5443_v51 = vmul.f32 %v3634_v11, %v3602_v60  ;;  %v3620_v7 = vadd.f32 %v3476_v30, %v3444_v32  ;;  %v3462_v16 = vsub.f32 %v2701_v47, %v5638_v55  ;;  %v3447_v59 = vmax.f32 %v5641_v33, 0.0  ;;  %v5646_v60 = vld [vmem:[#allocation24_spill] sm:$0xff]  ;;  %v5649_v15 = vld [vmem:[#allocation41_spill] sm:$0xff]  ;;  %v5650_v11 = vld [vmem:[#allocation42_spill] sm:$0xff] }
 0x2fc   :  { %v3637_v0 = vadd.f32 0.0009, %v3621_v20  ;;  %v3479_v3 = vmax.f32 %v3463_v52, 0.0  ;;  %v5645_v12 = vsub.f32 %v5643_v27, %v5644_v63  ;;  %v3506_v43 = vmul.f32 2.0, %v5646_v60  ;;  %v5651_v20 = vld [vmem:[#allocation29_spill] sm:$0xff]  ;;  %v5654_v33 = vld [vmem:[#allocation46_spill] sm:$0xff] }
 0x2fd   :  { %v3636_v6 = vadd.f32 0.0009, %v3620_v7  ;;  %v3478_v8 = vmax.f32 %v3462_v16, 0.0  ;;  %v4347_v35 = vpop.f32.mrb[64].mxu1  ;;  %4423 = vrcp.f32 %v5376_v4  ;;  %v3607_v36 = vadd.f32 0.0001, %v5649_v15 }
 0x2fe   :  { %v3446_v56 = vmax.f32 %v5645_v12, 0.0  ;;  %v5455_v31 = vmul.f32 %v3637_v0, %v3605_v38  ;;  %v3623_v58 = vadd.f32 %v3479_v3, %v3447_v59  ;;  %v3481_v19 = vsub.f32 %v4347_v35, %v5647_v28  ;;  %v3289_v37 = vpop.f32.mrb[65].mxu1  ;;  %v5653_v16 = vld [vmem:[#allocation18_spill] sm:$0xff]  ;;  %v5655_v63 = vld [vmem:[#allocation32_spill] sm:$0xff] }
 0x2ff   :  { %v5459_v24 = vmul.f32 %v3636_v6, %v3604_v18  ;;  %v3480_v46 = vsub.f32 %v3289_v37, %v5648_v9  ;;  %4425 = vrcp.f32 %v5381_v29  ;;  %v3606_v38 = vadd.f32 0.0001, %v5650_v11  ;;  %v5652_v18 = vld [vmem:[#allocation17_spill] sm:$0xff] }
 0x300   :  { %v3622_v21 = vadd.f32 %v3478_v8, %v3446_v56  ;;  %v3639_v49 = vadd.f32 0.0009, %v3623_v58  ;;  %v3529_v32 = vmul.f32 2.0, %v3481_v19  ;;  %v3509_v1 = vmul.f32 2.0, %v5651_v20  ;;  %v5656_v56 = vld [vmem:[#allocation47_spill] sm:$0xff] }
 0x301   :  { %v3528_v25 = vmul.f32 2.0, %v3480_v46  ;;  %v4350_v53 = vpop.f32.mrb[66].mxu1  ;;  %4427 = vrcp.f32 %v5392_v62  ;;  %v5473_v13 = vadd.f32 0.0001, %v3507_v10  ;;  %v5477_v27 = vadd.f32 0.0001, %v3506_v43 }
 0x302   :  { %v3638_v30 = vadd.f32 0.0009, %v3622_v21  ;;  %v5466_v52 = vmul.f32 %v3639_v49, %v3607_v36  ;;  %v3545_v4 = vadd.f32 0.0009, %v3529_v32  ;;  %v3483_v47 = vsub.f32 %v4350_v53, %v5652_v18  ;;  %v3299_v7 = vpop.f32.mrb[67].mxu1  ;;  %v4420_v3 = vpop.eup %4419  ;;  %v5657_v19 = vld [vmem:[#allocation19_spill] sm:$0xff] }
 0x303   :  { %v3544_v29 = vadd.f32 0.0009, %v3528_v25  ;;  %v3482_v61 = vsub.f32 %v3299_v7, %v5653_v16  ;;  %4429 = vrcp.f32 %v5396_v5  ;;  %v3508_v12 = vmul.f32 2.0, %v5655_v63  ;;  %v4422_v35 = vpop.eup %4421  ;;  %v5658_v43 = vld [vmem:[#allocation20_spill] sm:$0xff]  ;;  %v5659_v16 = vld [vmem:[#allocation37_spill] sm:$0xff] }
 0x304   :  { %v5470_v55 = vmul.f32 %v3638_v30, %v3606_v38  ;;  %v3561_v59 = vmul.f32 %v3545_v4, %v5654_v33  ;;  %v3531_v0 = vmul.f32 2.0, %v3483_v47  ;;  %v5481_v58 = vadd.f32 0.0001, %v3509_v1 }
 0x305   :  { %v3560_v6 = vmul.f32 %v3544_v29, %v5656_v56  ;;  %v3530_v62 = vmul.f32 2.0, %v3482_v61  ;;  %v4353_v8 = vpop.f32.mrb[68].mxu1  ;;  %4431 = vrcp.f32 %v5408_v22  ;;  %v5489_v11 = vadd.f32 0.0001, %v3508_v12 }
 0x306   :  { %v3673_v28 = vmul.f32 %v4420_v3, %v3561_v59  ;;  %v3547_v10 = vadd.f32 0.0009, %v3531_v0  ;;  %v3485_v37 = vsub.f32 %v4353_v8, %v5657_v19  ;;  %v3309_v5 = vpop.f32.mrb[69].mxu1  ;;  %4433 = vrcp.f32 %v5413_v48 }
 0x307   :  { %v3672_v21 = vmul.f32 %v4422_v35, %v3560_v6  ;;  %v3546_v9 = vadd.f32 0.0009, %v3530_v62  ;;  %v3484_v46 = vsub.f32 %v3309_v5, %v5658_v43  ;;  %v4424_v32 = vpop.eup %4423  ;;  %4435 = vrcp.f32 %v5424_v39 }
 0x308   :  { %v3689_v15 = vsel %vm109_vm0, %v3673_v28, 0.0  ;;  %v3563_v36 = vmul.f32 %v3547_v10, %v5345_v2  ;;  %v3533_v49 = vmul.f32 2.0, %v3485_v37  ;;  %v5497_v61 = vmul.f32 2.0, %v5659_v16 }
 0x309   :  { %v3688_v38 = vsel %vm109_vm0, %v3672_v21, 0.0  ;;  %v3562_v30 = vmul.f32 %v3546_v9, %v5348_v17  ;;  %v3532_v25 = vmul.f32 2.0, %v3484_v46  ;;  %v4356_v22 = vpop.f32.mrb[70].mxu1  ;;  %v4426_v53 = vpop.eup %4425  ;;  %4437 = vrcp.f32 %v5428_v41  ;;  %v5660_v17 = vld [vmem:[#allocation48_spill] sm:$0xff] }
 0x30a   :  { %v3690_v1 = vadd.f32 %v3689_v15, %v3688_v38  ;;  %v3675_v4 = vmul.f32 %v4424_v32, %v3563_v36  ;;  %v3549_v18 = vadd.f32 0.0009, %v3533_v49  ;;  %v3487_v48 = vsub.f32 %v4356_v22, %v5171_v40  ;;  %v3319_v47 = vpop.f32.mrb[71].mxu1 }
 0x30b   :  { %v3674_v2 = vmul.f32 %v4426_v53, %v3562_v30  ;;  %v3548_v7 = vadd.f32 0.0009, %v3532_v25  ;;  %v3486_v29 = vsub.f32 %v3319_v47, %v5177_v44  ;;  %v4428_v0 = vpop.eup %4427  ;;  %4439 = vrcp.f32 %v5439_v26 }
 0x30c   :  { %v3565_v33 = vmul.f32 %v3549_v18, %v5660_v17  ;;  %v3535_v59 = vmul.f32 2.0, %v3487_v48  ;;  %v3693_v41 = vsel %vm109_vm0, %v3675_v4, 0.0  ;;  %4441 = vrcp.f32 %v5443_v51 }
 0x30d   :  { %v3691_v40 = vsel %vm109_vm0, %v3674_v2, 0.0  ;;  %v3564_v3 = vmul.f32 %v3548_v7, %v5355_v57  ;;  %v3534_v39 = vmul.f32 2.0, %v3486_v29  ;;  %v4359_v12 = vpop.f32.mrb[72].mxu1  ;;  %v4430_v56 = vpop.eup %4429  ;;  %4443 = vrcp.f32 %v5455_v31 }
 0x30e   :  { %v3692_v6 = vadd.f32 %v3691_v40, %v3690_v1  ;;  %v3677_v44 = vmul.f32 %v4428_v0, %v3565_v33  ;;  %v3551_v62 = vadd.f32 0.0009, %v3535_v59  ;;  %v3489_v8 = vsub.f32 %v4359_v12, %v5191_v50  ;;  %v3329_v35 = vpop.f32.mrb[73].mxu1  ;;  %v5661_v0 = vld [vmem:[#allocation40_spill] sm:$0xff] }
 0x30f   :  { %v3676_v28 = vmul.f32 %v4430_v56, %v3564_v3  ;;  %v3550_v10 = vadd.f32 0.0009, %v3534_v39  ;;  %v3488_v19 = vsub.f32 %v3329_v35, %v5197_v54  ;;  %v4432_v5 = vpop.eup %4431  ;;  %4445 = vrcp.f32 %v5459_v24 }
 0x310   :  { %v3694_v26 = vadd.f32 %v3693_v41, %v3692_v6  ;;  %v3567_v57 = vmul.f32 %v3551_v62, %v5367_v34  ;;  %v3537_v37 = vmul.f32 2.0, %v3489_v8  ;;  %v4434_v46 = vpop.eup %4433  ;;  %v3697_v32 = vsel %vm109_vm0, %v3677_v44, 0.0 }
 0x311   :  { %v3695_v21 = vsel %vm109_vm0, %v3676_v28, 0.0  ;;  %v3566_v50 = vmul.f32 %v3550_v10, %v5379_v14  ;;  %v3536_v9 = vmul.f32 2.0, %v3488_v19  ;;  %v4362_v43 = vpop.f32.mrb[74].mxu1  ;;  %v4436_v22 = vpop.eup %4435  ;;  %4447 = vrcp.f32 %v5466_v52 }
 0x312   :  { %v3696_v15 = vadd.f32 %v3695_v21, %v3694_v26  ;;  %v3679_v36 = vmul.f32 %v4432_v5, %v3567_v57  ;;  %v3553_v49 = vadd.f32 0.0009, %v3537_v37  ;;  %v3491_v54 = vsub.f32 %v4362_v43, %v5642_v45  ;;  %v3339_v51 = vpop.f32.mrb[75].mxu1 }
 0x313   :  { %v3678_v34 = vmul.f32 %v4434_v46, %v3566_v50  ;;  %v3552_v38 = vadd.f32 0.0009, %v3536_v9  ;;  %v3490_v30 = vsub.f32 %v3339_v51, %v5646_v60  ;;  %v4438_v18 = vpop.eup %4437  ;;  %4449 = vrcp.f32 %v5470_v55 }
 0x314   :  { %v3698_v31 = vadd.f32 %v3697_v32, %v3696_v15  ;;  %v3569_v14 = vmul.f32 %v3553_v49, %v5399_v42  ;;  %v3539_v25 = vmul.f32 2.0, %v3491_v54  ;;  %v3701_v42 = vsel %vm109_vm0, %v3679_v36, 0.0 }
 0x315   :  { %v3699_v53 = vsel %vm109_vm0, %v3678_v34, 0.0  ;;  %v3568_v45 = vmul.f32 %v3552_v38, %v5411_v23  ;;  %v3538_v1 = vmul.f32 2.0, %v3490_v30  ;;  %v4365_v4 = vpop.f32.mrb[76].mxu1  ;;  %v4440_v7 = vpop.eup %4439  ;;  %v3510_v40 = vmul.f32 2.0, %v5661_v0 }
 0x316   :  { %v3700_v48 = vadd.f32 %v3699_v53, %v3698_v31  ;;  %v3681_v47 = vmul.f32 %v4436_v22, %v3569_v14  ;;  %v3555_v2 = vadd.f32 0.0009, %v3539_v25  ;;  %v3493_v60 = vsub.f32 %v4365_v4, %v5651_v20  ;;  %v3349_v24 = vpop.f32.mrb[77].mxu1  ;;  %v4442_v56 = vpop.eup %4441 }
 0x317   :  { %v3680_v29 = vmul.f32 %v4438_v18, %v3568_v45  ;;  %v3554_v17 = vadd.f32 0.0009, %v3538_v1  ;;  %v3492_v52 = vsub.f32 %v3349_v24, %v5655_v63  ;;  %v4444_v55 = vpop.eup %4443  ;;  %v3526_v46 = vadd.f32 0.0001, %v3510_v40 }
 0x318   :  { %v3702_v33 = vadd.f32 %v3701_v42, %v3700_v48  ;;  %v3571_v23 = vmul.f32 %v3555_v2, %v5473_v13  ;;  %v3541_v59 = vmul.f32 2.0, %v3493_v60  ;;  %v3705_v35 = vsel %vm109_vm0, %v3681_v47, 0.0 }
 0x319   :  { %v3703_v3 = vsel %vm109_vm0, %v3680_v29, 0.0  ;;  %v3570_v20 = vmul.f32 %v3554_v17, %v5477_v27  ;;  %v3540_v39 = vmul.f32 2.0, %v3492_v52  ;;  %v4368_v12 = vpop.f32.mrb[78].mxu1  ;;  %v4446_v5 = vpop.eup %4445 }
 0x31a   :  { %v3704_v6 = vadd.f32 %v3703_v3, %v3702_v33  ;;  %v3683_v44 = vmul.f32 %v4440_v7, %v3571_v23  ;;  %v3557_v62 = vadd.f32 0.0009, %v3541_v59  ;;  %v3495_v63 = vsub.f32 %v4368_v12, %v5659_v16  ;;  %v3359_v8 = vpop.f32.mrb[79].mxu1 }
 0x31b   :  { %v3682_v13 = vmul.f32 %v4442_v56, %v3570_v20  ;;  %v3556_v41 = vadd.f32 0.0009, %v3540_v39  ;;  %v3494_v28 = vsub.f32 %v3359_v8, %v5661_v0  ;;  %v3527_v16 = vadd.f32 0.0001, %v5497_v61  ;;  %v4448_v43 = vpop.eup %4447 }
 0x31c   :  { %v3706_v10 = vadd.f32 %v3705_v35, %v3704_v6  ;;  %v3573_v19 = vmul.f32 %v3557_v62, %v5481_v58  ;;  %v3543_v27 = vmul.f32 2.0, %v3495_v63  ;;  %v3709_v15 = vsel %vm109_vm0, %v3683_v44, 0.0 }
 0x31d   :  { %v3707_v26 = vsel %vm109_vm0, %v3682_v13, 0.0  ;;  %v3572_v57 = vmul.f32 %v3556_v41, %v5489_v11  ;;  %v3542_v37 = vmul.f32 2.0, %v3494_v28  ;;  %v4450_v34 = vpop.eup %4449 }
 0x31e   :  { %v3708_v21 = vadd.f32 %v3707_v26, %v3706_v10  ;;  %v3685_v50 = vmul.f32 %v4444_v55, %v3573_v19  ;;  %v3559_v9 = vadd.f32 0.0009, %v3543_v27 }
 0x31f   :  { %v3684_v36 = vmul.f32 %v4446_v5, %v3572_v57  ;;  %v3558_v49 = vadd.f32 0.0009, %v3542_v37 }
 0x320   :  { %v3575_v54 = vmul.f32 %v3559_v9, %v3527_v16  ;;  %v3710_v58 = vadd.f32 %v3709_v15, %v3708_v21  ;;  %v3713_v61 = vsel %vm109_vm0, %v3685_v50, 0.0 }
 0x321   :  { %v3711_v51 = vsel %vm109_vm0, %v3684_v36, 0.0  ;;  %v3574_v32 = vmul.f32 %v3558_v49, %v3526_v46 }
 0x322   :  { %v3687_v11 = vmul.f32 %v4448_v43, %v3575_v54  ;;  %v3712_v38 = vadd.f32 %v3711_v51, %v3710_v58 }
 0x323   :  { %v3686_v30 = vmul.f32 %v4450_v34, %v3574_v32 }
 0x324   :  { %v3714_v31 = vadd.f32 %v3713_v61, %v3712_v38  ;;  %v3717_v22 = vsel %vm109_vm0, %v3687_v11, 0.0 }
 0x325   :  { %v3715_v14 = vsel %vm109_vm0, %v3686_v30, 0.0 }
 0x326   :  { %v3716_v25 = vadd.f32 %v3715_v14, %v3714_v31 }
 0x328   :  { %v3718_v53 = vadd.f32 %v3717_v22, %v3716_v25 }
 0x32a   :  { %3719 = vadd.xlane.f32.xlu0 %v3718_v53 }
 0x3b7   :  { %v3720_v45 = vpop.xlane.xlu0 %3719 }
 0x3b8   :  { %v3721_v1 = vrot.slane %v3720_v45, 4 }
 0x3ba   :  { %v3722_v4 = vadd.f32 %v3721_v1, %v3720_v45 }
 0x3bc   :  { %v3723_v18 = vrot.slane %v3722_v4, 2 }
 0x3be   :  { %v3724_v48 = vadd.f32 %v3723_v18, %v3722_v4 }
 0x3c0   :  { %v3725_v47 = vrot.slane %v3724_v48, 1 }
 0x3c2   :  { %v3726_v2 = vadd.f32 %v3725_v47, %v3724_v48 }
 0x3c4   :  { %4409 = vpush %v3726_v2 }
 0x3f5   :  { %s4410_s28 = spop %4409 }
 0x3f6   :  { %v3728_v60 = vstv %s4410_s28 }
 0x3f7   :  { %3731 = vst.msk [vmem:[#allocation10] sm:$0x1] %vm3730_vm1, %v3728_v60 }
 0x3f8   :  { %4550 = shalt.err (!%p4547_p8)
}
 0x3f9   :  { %s4551_s15 = scalar_lea.hbm %s5556_s4, 16 }
 0x3fa   :  { %p4552_p9 = scmp.ne.s32.totalorder %s5556_s4, %s4551_s15  ;;  %p4555_p10 = scmp.lt.u32.totalorder %s4551_s15, %s5556_s4 }
 0x3fc   :  { %p4557_p11 = pnand %p4555_p10, %p4552_p9 }
 0x3fe   :  { %4560 = shalt.err (!%p4557_p11)
}
 0x3ff   :  { %3741 = dma.vmem_to_hbm [thread:$0]  %s3739_s27, 16, %s5556_s4, [#allocation4]  }
 0x400   :  { %4567 = dma.done.wait [#allocation4], 16  }
 0x401   :  { %4568 = vsyncadd [#allocation4], 4294967280 }
 0x402   :  { %3745 = vsyncpa [#allocation3], 1 }
 0x403   :  { %3746 = vsyncpa [#allocation6], 1 }
 0x404   :  { %3747 = vsyncpa [#allocation9], 1 }
 0x405   :  { %3748 = vsyncpa [#allocation4], 1 }

</bundles_post_ra>
